<compile_context>
chip_gen: v7x
topology: tpu7x:2x2x1
jax: 0.10.0
libtpu: 0.0.40
codegen_flags: <defaults>
</compile_context>

<pallas_src>
import functools
import math

import numpy as np
import jax
import jax.numpy as jnp
from jax import lax
from jax.experimental import pallas as pl
from jax.experimental.pallas import tpu as pltpu


def encoder_layer_kernel(nhead, eps,
                         src_ref, pos_ref,
                         wqk_ref, bqk_ref, wv_ref, bv_ref,
                         wo_ref, bo_ref,
                         w1_ref, b1_ref, w2_ref, b2_ref,
                         g1_ref, be1_ref, g2_ref, be2_ref,
                         out_ref):
    x = src_ref[0]                    # (L, E) f32
    p = pos_ref[0]                    # (L, E) f32
    L, E = x.shape
    dh = E // nhead

    # --- self attention: q = k = src + pos, v = src ------------------------
    qk_in = (x + p).astype(jnp.bfloat16)
    x_bf = x.astype(jnp.bfloat16)

    # fused [Q | K] projection (attention scale already folded into Q half).
    qk = jnp.dot(qk_in, wqk_ref[...],
                 preferred_element_type=jnp.float32) + bqk_ref[0]   # (L, 2E)
    v = jnp.dot(x_bf, wv_ref[...],
                preferred_element_type=jnp.float32) + bv_ref[0]     # (L, E)

    attn = jnp.zeros((L, E), jnp.float32)
    for h in range(nhead):            # static unroll, nhead is small
        q_h = qk[:, h * dh:(h + 1) * dh].astype(jnp.bfloat16)       # (L, dh)
        k_ht = qk[:, E + h * dh:E + (h + 1) * dh].T                 # (dh, L) f32
        s = jnp.dot(q_h, k_ht.astype(jnp.bfloat16),
                    preferred_element_type=jnp.float32)             # (L, L)
        s = s - jnp.max(s, axis=-1, keepdims=True)
        e = jnp.exp(s)
        a = e * pl.reciprocal(jnp.sum(e, axis=-1, keepdims=True), approx=True)
        v_h = v[:, h * dh:(h + 1) * dh].astype(jnp.bfloat16)        # (L, dh)
        o_h = jnp.dot(a.astype(jnp.bfloat16), v_h,
                      preferred_element_type=jnp.float32)           # (L, dh)
        # accumulate through this head's slice of the output projection
        # (replaces concatenate(heads) @ wo)
        attn = attn + jnp.dot(o_h.astype(jnp.bfloat16), wo_ref[h],
                              preferred_element_type=jnp.float32)   # (L, E)
    attn = attn + bo_ref[0]

    # --- residual + layernorm1 (dropout1 == identity in eval) ---------------
    y = x + attn
    mu = jnp.mean(y, axis=-1, keepdims=True)
    var = jnp.mean((y - mu) ** 2, axis=-1, keepdims=True)
    y = (y - mu) * lax.rsqrt(var + eps) * g1_ref[0] + be1_ref[0]

    # --- feed forward: linear1 -> relu -> linear2 (dropout == identity) -----
    h1 = jnp.maximum(
        jnp.dot(y.astype(jnp.bfloat16), w1_ref[...],
                preferred_element_type=jnp.float32) + b1_ref[0], 0.0)
    h2 = jnp.dot(h1.astype(jnp.bfloat16), w2_ref[...],
                 preferred_element_type=jnp.float32) + b2_ref[0]

    # --- residual + layernorm2 (dropout2 == identity) -----------------------
    z = y + h2
    mu2 = jnp.mean(z, axis=-1, keepdims=True)
    var2 = jnp.mean((z - mu2) ** 2, axis=-1, keepdims=True)
    z = (z - mu2) * lax.rsqrt(var2 + eps) * g2_ref[0] + be2_ref[0]

    out_ref[0] = z.astype(out_ref.dtype)


def transformer_encoder_layer(src, pos, params, nhead):
    """src, pos: (N, L, E) float32; params from make_kernel_params()."""
    N, L, E = src.shape
    Fd = params['w1'].shape[1]
    kernel = functools.partial(encoder_layer_kernel, nhead, 1e-5)

    def full_spec(a):
        zero = (0,) * a.ndim

        def idx(b):
            return zero
        return pl.BlockSpec(a.shape, idx)

    order = ['wqk', 'bqk', 'wv', 'bv', 'wo', 'bo',
             'w1', 'b1', 'w2', 'b2', 'g1', 'be1', 'g2', 'be2']
    in_specs = [pl.BlockSpec((1, L, E), lambda b: (b, 0, 0)),   # src
                pl.BlockSpec((1, L, E), lambda b: (b, 0, 0))]   # pos
    in_specs += [full_spec(params[k]) for k in order]

    # Advisory cost estimate so XLA schedules work around the custom call.
    flops = int(N * (2 * L * E * (2 * E)      # fused q/k projection
                     + 2 * L * E * E          # v projection
                     + 4 * L * L * E          # scores + probs @ v (all heads)
                     + 2 * L * E * E          # per-head out-projection
                     + 4 * L * E * Fd))       # FFN
    transcendentals = int(N * (nhead * L * L + 4 * L))
    bytes_accessed = int(3 * N * L * E * 4                 # src, pos, out (f32)
                         + 2 * (4 * E * E + 2 * E * Fd)    # bf16 weights
                         + 4 * (9 * E + Fd))               # f32 biases / norms

    return pl.pallas_call(
        kernel,
        out_shape=jax.ShapeDtypeStruct((N, L, E), src.dtype),
        grid_spec=pltpu.PrefetchScalarGridSpec(
            num_scalar_prefetch=0,
            grid=(N,),
            in_specs=in_specs,
            out_specs=pl.BlockSpec((1, L, E), lambda b: (b, 0, 0)),
        ),
        compiler_params=pltpu.CompilerParams(
            dimension_semantics=("parallel",),        # batch is independent
            vmem_limit_bytes=64 * 1024 * 1024),       # explicit VMEM budget
        cost_estimate=pl.CostEstimate(flops=flops,
                                      transcendentals=transcendentals,
                                      bytes_accessed=bytes_accessed),
    )(src, pos, *[params[k] for k in order])


def make_kernel_params(raw, nhead):
    """Convert PyTorch-layout weights into the kernel's fused / bf16 layout."""
    E = raw['out_proj_w'].shape[0]
    Fd = raw['lin1_w'].shape[0]
    dh = E // nhead
    scale = 1.0 / math.sqrt(dh)
    wq = raw['in_proj_w'][0:E].T            # x @ W layout
    wk = raw['in_proj_w'][E:2 * E].T
    wv = raw['in_proj_w'][2 * E:].T
    bq = raw['in_proj_b'][0:E]
    bk = raw['in_proj_b'][E:2 * E]
    bv = raw['in_proj_b'][2 * E:]
    return {
        # attention scale folded into the Q half of the fused weight / bias
        'wqk': jnp.concatenate([wq * scale, wk], axis=1).astype(jnp.bfloat16),
        'bqk': jnp.concatenate([bq * scale, bk]).reshape(1, 2 * E),
        'wv': wv.astype(jnp.bfloat16),
        'bv': bv.reshape(1, E),
        # out-projection reshaped so heads are selected on the leading axis
        'wo': raw['out_proj_w'].T.reshape(nhead, dh, E).astype(jnp.bfloat16),
        'bo': raw['out_proj_b'].reshape(1, E),
        'w1': raw['lin1_w'].T.astype(jnp.bfloat16),
        'b1': raw['lin1_b'].reshape(1, Fd),
        'w2': raw['lin2_w'].T.astype(jnp.bfloat16),
        'b2': raw['lin2_b'].reshape(1, E),
        'g1': raw['g1'].reshape(1, E), 'be1': raw['be1'].reshape(1, E),
        'g2': raw['g2'].reshape(1, E), 'be2': raw['be2'].reshape(1, E),
    }


def reference_jax(src, pos, raw, nhead):
    """Pure-JAX f32 reference matching PyTorch forward_post semantics (eval)."""
    N, L, E = src.shape
    dh = E // nhead
    scale = 1.0 / math.sqrt(dh)
    wq = raw['in_proj_w'][0:E].T
    wk = raw['in_proj_w'][E:2 * E].T
    wv = raw['in_proj_w'][2 * E:].T
    bq = raw['in_proj_b'][0:E]
    bk = raw['in_proj_b'][E:2 * E]
    bv = raw['in_proj_b'][2 * E:]
    qkin = src + pos
    q = qkin @ wq + bq
    k = qkin @ wk + bk
    v = src @ wv + bv
    qh = q.reshape(N, L, nhead, dh).transpose(0, 2, 1, 3) * scale
    kh = k.reshape(N, L, nhead, dh).transpose(0, 2, 1, 3)
    vh = v.reshape(N, L, nhead, dh).transpose(0, 2, 1, 3)
    s = jnp.einsum('bhqd,bhkd->bhqk', qh, kh)
    a = jax.nn.softmax(s, axis=-1)
    o = jnp.einsum('bhqk,bhkd->bhqd', a, vh).transpose(0, 2, 1, 3).reshape(N, L, E)
    o = o @ raw['out_proj_w'].T + raw['out_proj_b']
    y = src + o
    mu = y.mean(-1, keepdims=True)
    var = ((y - mu) ** 2).mean(-1, keepdims=True)
    y = (y - mu) / jnp.sqrt(var + 1e-5) * raw['g1'] + raw['be1']
    h = jnp.maximum(y @ raw['lin1_w'].T + raw['lin1_b'], 0.0)
    h = h @ raw['lin2_w'].T + raw['lin2_b']
    z = y + h
    mu2 = z.mean(-1, keepdims=True)
    var2 = ((z - mu2) ** 2).mean(-1, keepdims=True)
    return (z - mu2) / jnp.sqrt(var2 + 1e-5) * raw['g2'] + raw['be2']


if __name__ == "__main__":
    # small but lane/sublane-friendly shapes:
    # batch=2, seq=16, d_model=128, nhead=4 (dh=32), dim_feedforward=256
    N, L, E, H, Fd = 2, 16, 128, 4, 256
    key = jax.random.PRNGKey(0)
    ks = jax.random.split(key, 10)

    src = jax.random.normal(ks[0], (N, L, E), jnp.float32)
    pos = jax.random.normal(ks[1], (N, L, E), jnp.float32)

    raw = {
        # nn.MultiheadAttention packed in_proj (3E, E) and out_proj (E, E)
        'in_proj_w': jax.random.normal(ks[2], (3 * E, E), jnp.float32) * 0.05,
        'in_proj_b': jax.random.normal(ks[3], (3 * E,), jnp.float32) * 0.05,
        'out_proj_w': jax.random.normal(ks[4], (E, E), jnp.float32) * 0.05,
        'out_proj_b': jax.random.normal(ks[5], (E,), jnp.float32) * 0.05,
        # nn.Linear weights are (out_features, in_features)
        'lin1_w': jax.random.normal(ks[6], (Fd, E), jnp.float32) * 0.05,
        'lin1_b': jax.random.normal(ks[7], (Fd,), jnp.float32) * 0.05,
        'lin2_w': jax.random.normal(ks[8], (E, Fd), jnp.float32) * 0.05,
        'lin2_b': jax.random.normal(ks[9], (E,), jnp.float32) * 0.05,
        'g1': jnp.ones((E,), jnp.float32), 'be1': jnp.zeros((E,), jnp.float32),
        'g2': jnp.ones((E,), jnp.float32), 'be2': jnp.zeros((E,), jnp.float32),
    }

    params = make_kernel_params(raw, H)
    out = transformer_encoder_layer(src, pos, params, H)
    out = jax.block_until_ready(out)

    ref = reference_jax(src, pos, raw, H)
    # bf16 MXU operands + approx reciprocal -> looser tolerance than pure f32
    np.testing.assert_allclose(np.asarray(out), np.asarray(ref),
                               rtol=5e-2, atol=5e-2)
    print("KERNEL_OK")
</pallas_src>

<mosaic_0001>
module attributes {stable_mosaic.version = 11 : i64} {
  func.func @encoder_layer_kernel(%arg0: i32, %arg1: memref<1x16x128xf32, #tpu.memory_space<vmem>>, %arg2: memref<1x16x128xf32, #tpu.memory_space<vmem>>, %arg3: memref<128x256xbf16, #tpu.memory_space<vmem>>, %arg4: memref<1x256xf32, #tpu.memory_space<vmem>>, %arg5: memref<128x128xbf16, #tpu.memory_space<vmem>>, %arg6: memref<1x128xf32, #tpu.memory_space<vmem>>, %arg7: memref<4x32x128xbf16, #tpu.memory_space<vmem>>, %arg8: memref<1x128xf32, #tpu.memory_space<vmem>>, %arg9: memref<128x256xbf16, #tpu.memory_space<vmem>>, %arg10: memref<1x256xf32, #tpu.memory_space<vmem>>, %arg11: memref<256x128xbf16, #tpu.memory_space<vmem>>, %arg12: memref<1x128xf32, #tpu.memory_space<vmem>>, %arg13: memref<1x128xf32, #tpu.memory_space<vmem>>, %arg14: memref<1x128xf32, #tpu.memory_space<vmem>>, %arg15: memref<1x128xf32, #tpu.memory_space<vmem>>, %arg16: memref<1x128xf32, #tpu.memory_space<vmem>>, %arg17: memref<1x16x128xf32, #tpu.memory_space<vmem>>) attributes {dimension_semantics = [#tpu.dimension_semantics<parallel>], iteration_bounds = array<i64: 2>, scalar_prefetch = 0 : i64, scratch_operands = 0 : i64, tpu.core_type = #tpu.core_type<tc>, window_params = [{transform_indices = @transform_0, window_bounds = array<i64: 1, 16, 128>}, {transform_indices = @transform_1, window_bounds = array<i64: 1, 16, 128>}, {pipeline_mode = #tpu.pipeline_mode<synchronous>, transform_indices = @transform_2, window_bounds = array<i64: 128, 256>}, {pipeline_mode = #tpu.pipeline_mode<synchronous>, transform_indices = @transform_3, window_bounds = array<i64: 1, 256>}, {pipeline_mode = #tpu.pipeline_mode<synchronous>, transform_indices = @transform_4, window_bounds = array<i64: 128, 128>}, {pipeline_mode = #tpu.pipeline_mode<synchronous>, transform_indices = @transform_5, window_bounds = array<i64: 1, 128>}, {pipeline_mode = #tpu.pipeline_mode<synchronous>, transform_indices = @transform_6, window_bounds = array<i64: 4, 32, 128>}, {pipeline_mode = #tpu.pipeline_mode<synchronous>, transform_indices = @transform_7, window_bounds = array<i64: 1, 128>}, {pipeline_mode = #tpu.pipeline_mode<synchronous>, transform_indices = @transform_8, window_bounds = array<i64: 128, 256>}, {pipeline_mode = #tpu.pipeline_mode<synchronous>, transform_indices = @transform_9, window_bounds = array<i64: 1, 256>}, {pipeline_mode = #tpu.pipeline_mode<synchronous>, transform_indices = @transform_10, window_bounds = array<i64: 256, 128>}, {pipeline_mode = #tpu.pipeline_mode<synchronous>, transform_indices = @transform_11, window_bounds = array<i64: 1, 128>}, {pipeline_mode = #tpu.pipeline_mode<synchronous>, transform_indices = @transform_12, window_bounds = array<i64: 1, 128>}, {pipeline_mode = #tpu.pipeline_mode<synchronous>, transform_indices = @transform_13, window_bounds = array<i64: 1, 128>}, {pipeline_mode = #tpu.pipeline_mode<synchronous>, transform_indices = @transform_14, window_bounds = array<i64: 1, 128>}, {pipeline_mode = #tpu.pipeline_mode<synchronous>, transform_indices = @transform_15, window_bounds = array<i64: 1, 128>}, {transform_indices = @transform_16, window_bounds = array<i64: 1, 16, 128>}]} {
    %c0 = arith.constant 0 : index
    %c0_0 = arith.constant 0 : index
    %c0_1 = arith.constant 0 : index
    %0 = vector.load %arg1[%c0, %c0_0, %c0_1] : memref<1x16x128xf32, #tpu.memory_space<vmem>>, vector<1x16x128xf32>
    %1 = vector.shape_cast %0 : vector<1x16x128xf32> to vector<16x128xf32>
    %c0_2 = arith.constant 0 : index
    %c0_3 = arith.constant 0 : index
    %c0_4 = arith.constant 0 : index
    %2 = vector.load %arg2[%c0_2, %c0_3, %c0_4] : memref<1x16x128xf32, #tpu.memory_space<vmem>>, vector<1x16x128xf32>
    %3 = vector.shape_cast %2 : vector<1x16x128xf32> to vector<16x128xf32>
    %4 = arith.addf %1, %3 : vector<16x128xf32>
    %5 = arith.truncf %4 : vector<16x128xf32> to vector<16x128xbf16>
    %6 = arith.truncf %1 : vector<16x128xf32> to vector<16x128xbf16>
    %c0_5 = arith.constant 0 : index
    %c0_6 = arith.constant 0 : index
    %7 = vector.load %arg3[%c0_5, %c0_6] : memref<128x256xbf16, #tpu.memory_space<vmem>>, vector<128x256xbf16>
    %cst = arith.constant dense<0.000000e+00> : vector<16x256xf32>
    %8 = tpu.matmul %5, %7, %cst {dimension_numbers = #tpu.dot_dimension_numbers<[1], [0], [0], [1], [0, 0, 1, 1], [], []>} : vector<16x128xbf16>, vector<128x256xbf16>, vector<16x256xf32> -> vector<16x256xf32>
    %c0_7 = arith.constant 0 : index
    %c0_8 = arith.constant 0 : index
    %9 = vector.load %arg4[%c0_7, %c0_8] : memref<1x256xf32, #tpu.memory_space<vmem>>, vector<1x256xf32>
    %10 = vector.shape_cast %9 : vector<1x256xf32> to vector<256xf32>
    %11 = vector.shape_cast %10 : vector<256xf32> to vector<1x256xf32>
    %12 = vector.broadcast %11 : vector<1x256xf32> to vector<16x256xf32>
    %13 = arith.addf %8, %12 : vector<16x256xf32>
    %c0_9 = arith.constant 0 : index
    %c0_10 = arith.constant 0 : index
    %14 = vector.load %arg5[%c0_9, %c0_10] : memref<128x128xbf16, #tpu.memory_space<vmem>>, vector<128x128xbf16>
    %cst_11 = arith.constant dense<0.000000e+00> : vector<16x128xf32>
    %15 = tpu.matmul %6, %14, %cst_11 {dimension_numbers = #tpu.dot_dimension_numbers<[1], [0], [0], [1], [0, 0, 1, 1], [], []>} : vector<16x128xbf16>, vector<128x128xbf16>, vector<16x128xf32> -> vector<16x128xf32>
    %c0_12 = arith.constant 0 : index
    %c0_13 = arith.constant 0 : index
    %16 = vector.load %arg6[%c0_12, %c0_13] : memref<1x128xf32, #tpu.memory_space<vmem>>, vector<1x128xf32>
    %17 = vector.shape_cast %16 : vector<1x128xf32> to vector<128xf32>
    %18 = vector.shape_cast %17 : vector<128xf32> to vector<1x128xf32>
    %19 = vector.broadcast %18 : vector<1x128xf32> to vector<16x128xf32>
    %20 = arith.addf %15, %19 : vector<16x128xf32>
    %cst_14 = arith.constant 0.000000e+00 : f32
    %21 = vector.broadcast %cst_14 : f32 to vector<16x128xf32>
    %22 = vector.extract_strided_slice %13 {offsets = [0, 0], sizes = [16, 32], strides = [1, 1]} : vector<16x256xf32> to vector<16x32xf32>
    %23 = arith.truncf %22 : vector<16x32xf32> to vector<16x32xbf16>
    %24 = vector.extract_strided_slice %13 {offsets = [0, 128], sizes = [16, 32], strides = [1, 1]} : vector<16x256xf32> to vector<16x32xf32>
    %25 = tpu.transpose %24, [1, 0] : vector<16x32xf32> -> vector<32x16xf32>
    %26 = arith.truncf %25 : vector<32x16xf32> to vector<32x16xbf16>
    %cst_15 = arith.constant dense<0.000000e+00> : vector<16x16xf32>
    %27 = tpu.matmul %23, %26, %cst_15 {dimension_numbers = #tpu.dot_dimension_numbers<[1], [0], [0], [1], [0, 0, 1, 1], [], []>} : vector<16x32xbf16>, vector<32x16xbf16>, vector<16x16xf32> -> vector<16x16xf32>
    %cst_16 = arith.constant dense<0xFF800000> : vector<16xf32>
    %28 = vector.multi_reduction <maximumf>, %27, %cst_16 [1] : vector<16x16xf32> to vector<16xf32>
    %29 = vector.shape_cast %28 : vector<16xf32> to vector<16x1xf32>
    %30 = vector.broadcast %29 : vector<16x1xf32> to vector<16x16xf32>
    %31 = arith.subf %27, %30 : vector<16x16xf32>
    %32 = math.exp %31 : vector<16x16xf32>
    %cst_17 = arith.constant dense<0.000000e+00> : vector<16xf32>
    %33 = vector.multi_reduction <add>, %32, %cst_17 [1] : vector<16x16xf32> to vector<16xf32>
    %34 = vector.shape_cast %33 : vector<16xf32> to vector<16x1xf32>
    %35 = tpu.reciprocal %34 {approx = true} : vector<16x1xf32> -> vector<16x1xf32>
    %36 = vector.broadcast %35 : vector<16x1xf32> to vector<16x16xf32>
    %37 = arith.mulf %32, %36 : vector<16x16xf32>
    %38 = vector.extract_strided_slice %20 {offsets = [0, 0], sizes = [16, 32], strides = [1, 1]} : vector<16x128xf32> to vector<16x32xf32>
    %39 = arith.truncf %38 : vector<16x32xf32> to vector<16x32xbf16>
    %40 = arith.truncf %37 : vector<16x16xf32> to vector<16x16xbf16>
    %cst_18 = arith.constant dense<0.000000e+00> : vector<16x32xf32>
    %41 = tpu.matmul %40, %39, %cst_18 {dimension_numbers = #tpu.dot_dimension_numbers<[1], [0], [0], [1], [0, 0, 1, 1], [], []>} : vector<16x16xbf16>, vector<16x32xbf16>, vector<16x32xf32> -> vector<16x32xf32>
    %42 = arith.truncf %41 : vector<16x32xf32> to vector<16x32xbf16>
    %c0_19 = arith.constant 0 : index
    %c0_20 = arith.constant 0 : index
    %c0_21 = arith.constant 0 : index
    %43 = vector.load %arg7[%c0_19, %c0_20, %c0_21] : memref<4x32x128xbf16, #tpu.memory_space<vmem>>, vector<1x32x128xbf16>
    %44 = vector.shape_cast %43 : vector<1x32x128xbf16> to vector<32x128xbf16>
    %cst_22 = arith.constant dense<0.000000e+00> : vector<16x128xf32>
    %45 = tpu.matmul %42, %44, %cst_22 {dimension_numbers = #tpu.dot_dimension_numbers<[1], [0], [0], [1], [0, 0, 1, 1], [], []>} : vector<16x32xbf16>, vector<32x128xbf16>, vector<16x128xf32> -> vector<16x128xf32>
    %46 = arith.addf %21, %45 : vector<16x128xf32>
    %47 = vector.extract_strided_slice %13 {offsets = [0, 32], sizes = [16, 32], strides = [1, 1]} : vector<16x256xf32> to vector<16x32xf32>
    %48 = arith.truncf %47 : vector<16x32xf32> to vector<16x32xbf16>
    %49 = vector.extract_strided_slice %13 {offsets = [0, 160], sizes = [16, 32], strides = [1, 1]} : vector<16x256xf32> to vector<16x32xf32>
    %50 = tpu.transpose %49, [1, 0] : vector<16x32xf32> -> vector<32x16xf32>
    %51 = arith.truncf %50 : vector<32x16xf32> to vector<32x16xbf16>
    %cst_23 = arith.constant dense<0.000000e+00> : vector<16x16xf32>
    %52 = tpu.matmul %48, %51, %cst_23 {dimension_numbers = #tpu.dot_dimension_numbers<[1], [0], [0], [1], [0, 0, 1, 1], [], []>} : vector<16x32xbf16>, vector<32x16xbf16>, vector<16x16xf32> -> vector<16x16xf32>
    %cst_24 = arith.constant dense<0xFF800000> : vector<16xf32>
    %53 = vector.multi_reduction <maximumf>, %52, %cst_24 [1] : vector<16x16xf32> to vector<16xf32>
    %54 = vector.shape_cast %53 : vector<16xf32> to vector<16x1xf32>
    %55 = vector.broadcast %54 : vector<16x1xf32> to vector<16x16xf32>
    %56 = arith.subf %52, %55 : vector<16x16xf32>
    %57 = math.exp %56 : vector<16x16xf32>
    %cst_25 = arith.constant dense<0.000000e+00> : vector<16xf32>
    %58 = vector.multi_reduction <add>, %57, %cst_25 [1] : vector<16x16xf32> to vector<16xf32>
    %59 = vector.shape_cast %58 : vector<16xf32> to vector<16x1xf32>
    %60 = tpu.reciprocal %59 {approx = true} : vector<16x1xf32> -> vector<16x1xf32>
    %61 = vector.broadcast %60 : vector<16x1xf32> to vector<16x16xf32>
    %62 = arith.mulf %57, %61 : vector<16x16xf32>
    %63 = vector.extract_strided_slice %20 {offsets = [0, 32], sizes = [16, 32], strides = [1, 1]} : vector<16x128xf32> to vector<16x32xf32>
    %64 = arith.truncf %63 : vector<16x32xf32> to vector<16x32xbf16>
    %65 = arith.truncf %62 : vector<16x16xf32> to vector<16x16xbf16>
    %cst_26 = arith.constant dense<0.000000e+00> : vector<16x32xf32>
    %66 = tpu.matmul %65, %64, %cst_26 {dimension_numbers = #tpu.dot_dimension_numbers<[1], [0], [0], [1], [0, 0, 1, 1], [], []>} : vector<16x16xbf16>, vector<16x32xbf16>, vector<16x32xf32> -> vector<16x32xf32>
    %67 = arith.truncf %66 : vector<16x32xf32> to vector<16x32xbf16>
    %c1 = arith.constant 1 : index
    %c0_27 = arith.constant 0 : index
    %c0_28 = arith.constant 0 : index
    %68 = vector.load %arg7[%c1, %c0_27, %c0_28] : memref<4x32x128xbf16, #tpu.memory_space<vmem>>, vector<1x32x128xbf16>
    %69 = vector.shape_cast %68 : vector<1x32x128xbf16> to vector<32x128xbf16>
    %cst_29 = arith.constant dense<0.000000e+00> : vector<16x128xf32>
    %70 = tpu.matmul %67, %69, %cst_29 {dimension_numbers = #tpu.dot_dimension_numbers<[1], [0], [0], [1], [0, 0, 1, 1], [], []>} : vector<16x32xbf16>, vector<32x128xbf16>, vector<16x128xf32> -> vector<16x128xf32>
    %71 = arith.addf %46, %70 : vector<16x128xf32>
    %72 = vector.extract_strided_slice %13 {offsets = [0, 64], sizes = [16, 32], strides = [1, 1]} : vector<16x256xf32> to vector<16x32xf32>
    %73 = arith.truncf %72 : vector<16x32xf32> to vector<16x32xbf16>
    %74 = vector.extract_strided_slice %13 {offsets = [0, 192], sizes = [16, 32], strides = [1, 1]} : vector<16x256xf32> to vector<16x32xf32>
    %75 = tpu.transpose %74, [1, 0] : vector<16x32xf32> -> vector<32x16xf32>
    %76 = arith.truncf %75 : vector<32x16xf32> to vector<32x16xbf16>
    %cst_30 = arith.constant dense<0.000000e+00> : vector<16x16xf32>
    %77 = tpu.matmul %73, %76, %cst_30 {dimension_numbers = #tpu.dot_dimension_numbers<[1], [0], [0], [1], [0, 0, 1, 1], [], []>} : vector<16x32xbf16>, vector<32x16xbf16>, vector<16x16xf32> -> vector<16x16xf32>
    %cst_31 = arith.constant dense<0xFF800000> : vector<16xf32>
    %78 = vector.multi_reduction <maximumf>, %77, %cst_31 [1] : vector<16x16xf32> to vector<16xf32>
    %79 = vector.shape_cast %78 : vector<16xf32> to vector<16x1xf32>
    %80 = vector.broadcast %79 : vector<16x1xf32> to vector<16x16xf32>
    %81 = arith.subf %77, %80 : vector<16x16xf32>
    %82 = math.exp %81 : vector<16x16xf32>
    %cst_32 = arith.constant dense<0.000000e+00> : vector<16xf32>
    %83 = vector.multi_reduction <add>, %82, %cst_32 [1] : vector<16x16xf32> to vector<16xf32>
    %84 = vector.shape_cast %83 : vector<16xf32> to vector<16x1xf32>
    %85 = tpu.reciprocal %84 {approx = true} : vector<16x1xf32> -> vector<16x1xf32>
    %86 = vector.broadcast %85 : vector<16x1xf32> to vector<16x16xf32>
    %87 = arith.mulf %82, %86 : vector<16x16xf32>
    %88 = vector.extract_strided_slice %20 {offsets = [0, 64], sizes = [16, 32], strides = [1, 1]} : vector<16x128xf32> to vector<16x32xf32>
    %89 = arith.truncf %88 : vector<16x32xf32> to vector<16x32xbf16>
    %90 = arith.truncf %87 : vector<16x16xf32> to vector<16x16xbf16>
    %cst_33 = arith.constant dense<0.000000e+00> : vector<16x32xf32>
    %91 = tpu.matmul %90, %89, %cst_33 {dimension_numbers = #tpu.dot_dimension_numbers<[1], [0], [0], [1], [0, 0, 1, 1], [], []>} : vector<16x16xbf16>, vector<16x32xbf16>, vector<16x32xf32> -> vector<16x32xf32>
    %92 = arith.truncf %91 : vector<16x32xf32> to vector<16x32xbf16>
    %c2 = arith.constant 2 : index
    %c0_34 = arith.constant 0 : index
    %c0_35 = arith.constant 0 : index
    %93 = vector.load %arg7[%c2, %c0_34, %c0_35] : memref<4x32x128xbf16, #tpu.memory_space<vmem>>, vector<1x32x128xbf16>
    %94 = vector.shape_cast %93 : vector<1x32x128xbf16> to vector<32x128xbf16>
    %cst_36 = arith.constant dense<0.000000e+00> : vector<16x128xf32>
    %95 = tpu.matmul %92, %94, %cst_36 {dimension_numbers = #tpu.dot_dimension_numbers<[1], [0], [0], [1], [0, 0, 1, 1], [], []>} : vector<16x32xbf16>, vector<32x128xbf16>, vector<16x128xf32> -> vector<16x128xf32>
    %96 = arith.addf %71, %95 : vector<16x128xf32>
    %97 = vector.extract_strided_slice %13 {offsets = [0, 96], sizes = [16, 32], strides = [1, 1]} : vector<16x256xf32> to vector<16x32xf32>
    %98 = arith.truncf %97 : vector<16x32xf32> to vector<16x32xbf16>
    %99 = vector.extract_strided_slice %13 {offsets = [0, 224], sizes = [16, 32], strides = [1, 1]} : vector<16x256xf32> to vector<16x32xf32>
    %100 = tpu.transpose %99, [1, 0] : vector<16x32xf32> -> vector<32x16xf32>
    %101 = arith.truncf %100 : vector<32x16xf32> to vector<32x16xbf16>
    %cst_37 = arith.constant dense<0.000000e+00> : vector<16x16xf32>
    %102 = tpu.matmul %98, %101, %cst_37 {dimension_numbers = #tpu.dot_dimension_numbers<[1], [0], [0], [1], [0, 0, 1, 1], [], []>} : vector<16x32xbf16>, vector<32x16xbf16>, vector<16x16xf32> -> vector<16x16xf32>
    %cst_38 = arith.constant dense<0xFF800000> : vector<16xf32>
    %103 = vector.multi_reduction <maximumf>, %102, %cst_38 [1] : vector<16x16xf32> to vector<16xf32>
    %104 = vector.shape_cast %103 : vector<16xf32> to vector<16x1xf32>
    %105 = vector.broadcast %104 : vector<16x1xf32> to vector<16x16xf32>
    %106 = arith.subf %102, %105 : vector<16x16xf32>
    %107 = math.exp %106 : vector<16x16xf32>
    %cst_39 = arith.constant dense<0.000000e+00> : vector<16xf32>
    %108 = vector.multi_reduction <add>, %107, %cst_39 [1] : vector<16x16xf32> to vector<16xf32>
    %109 = vector.shape_cast %108 : vector<16xf32> to vector<16x1xf32>
    %110 = tpu.reciprocal %109 {approx = true} : vector<16x1xf32> -> vector<16x1xf32>
    %111 = vector.broadcast %110 : vector<16x1xf32> to vector<16x16xf32>
    %112 = arith.mulf %107, %111 : vector<16x16xf32>
    %113 = vector.extract_strided_slice %20 {offsets = [0, 96], sizes = [16, 32], strides = [1, 1]} : vector<16x128xf32> to vector<16x32xf32>
    %114 = arith.truncf %113 : vector<16x32xf32> to vector<16x32xbf16>
    %115 = arith.truncf %112 : vector<16x16xf32> to vector<16x16xbf16>
    %cst_40 = arith.constant dense<0.000000e+00> : vector<16x32xf32>
    %116 = tpu.matmul %115, %114, %cst_40 {dimension_numbers = #tpu.dot_dimension_numbers<[1], [0], [0], [1], [0, 0, 1, 1], [], []>} : vector<16x16xbf16>, vector<16x32xbf16>, vector<16x32xf32> -> vector<16x32xf32>
    %117 = arith.truncf %116 : vector<16x32xf32> to vector<16x32xbf16>
    %c3 = arith.constant 3 : index
    %c0_41 = arith.constant 0 : index
    %c0_42 = arith.constant 0 : index
    %118 = vector.load %arg7[%c3, %c0_41, %c0_42] : memref<4x32x128xbf16, #tpu.memory_space<vmem>>, vector<1x32x128xbf16>
    %119 = vector.shape_cast %118 : vector<1x32x128xbf16> to vector<32x128xbf16>
    %cst_43 = arith.constant dense<0.000000e+00> : vector<16x128xf32>
    %120 = tpu.matmul %117, %119, %cst_43 {dimension_numbers = #tpu.dot_dimension_numbers<[1], [0], [0], [1], [0, 0, 1, 1], [], []>} : vector<16x32xbf16>, vector<32x128xbf16>, vector<16x128xf32> -> vector<16x128xf32>
    %121 = arith.addf %96, %120 : vector<16x128xf32>
    %c0_44 = arith.constant 0 : index
    %c0_45 = arith.constant 0 : index
    %122 = vector.load %arg8[%c0_44, %c0_45] : memref<1x128xf32, #tpu.memory_space<vmem>>, vector<1x128xf32>
    %123 = vector.shape_cast %122 : vector<1x128xf32> to vector<128xf32>
    %124 = vector.shape_cast %123 : vector<128xf32> to vector<1x128xf32>
    %125 = vector.broadcast %124 : vector<1x128xf32> to vector<16x128xf32>
    %126 = arith.addf %121, %125 : vector<16x128xf32>
    %127 = arith.addf %1, %126 : vector<16x128xf32>
    %cst_46 = arith.constant dense<0.000000e+00> : vector<16xf32>
    %128 = vector.multi_reduction <add>, %127, %cst_46 [1] : vector<16x128xf32> to vector<16xf32>
    %129 = vector.shape_cast %128 : vector<16xf32> to vector<16x1xf32>
    %cst_47 = arith.constant 1.280000e+02 : f32
    %130 = vector.broadcast %cst_47 : f32 to vector<16x1xf32>
    %131 = arith.divf %129, %130 : vector<16x1xf32>
    %132 = vector.broadcast %131 : vector<16x1xf32> to vector<16x128xf32>
    %133 = arith.subf %127, %132 : vector<16x128xf32>
    %134 = arith.mulf %133, %133 : vector<16x128xf32>
    %cst_48 = arith.constant dense<0.000000e+00> : vector<16xf32>
    %135 = vector.multi_reduction <add>, %134, %cst_48 [1] : vector<16x128xf32> to vector<16xf32>
    %136 = vector.shape_cast %135 : vector<16xf32> to vector<16x1xf32>
    %cst_49 = arith.constant 1.280000e+02 : f32
    %137 = vector.broadcast %cst_49 : f32 to vector<16x1xf32>
    %138 = arith.divf %136, %137 : vector<16x1xf32>
    %139 = vector.broadcast %131 : vector<16x1xf32> to vector<16x128xf32>
    %140 = arith.subf %127, %139 : vector<16x128xf32>
    %cst_50 = arith.constant 9.99999974E-6 : f32
    %141 = vector.broadcast %cst_50 : f32 to vector<16x1xf32>
    %142 = arith.addf %138, %141 : vector<16x1xf32>
    %143 = math.rsqrt %142 : vector<16x1xf32>
    %144 = vector.broadcast %143 : vector<16x1xf32> to vector<16x128xf32>
    %145 = arith.mulf %140, %144 : vector<16x128xf32>
    %c0_51 = arith.constant 0 : index
    %c0_52 = arith.constant 0 : index
    %146 = vector.load %arg13[%c0_51, %c0_52] : memref<1x128xf32, #tpu.memory_space<vmem>>, vector<1x128xf32>
    %147 = vector.shape_cast %146 : vector<1x128xf32> to vector<128xf32>
    %148 = vector.shape_cast %147 : vector<128xf32> to vector<1x128xf32>
    %149 = vector.broadcast %148 : vector<1x128xf32> to vector<16x128xf32>
    %150 = arith.mulf %145, %149 : vector<16x128xf32>
    %c0_53 = arith.constant 0 : index
    %c0_54 = arith.constant 0 : index
    %151 = vector.load %arg14[%c0_53, %c0_54] : memref<1x128xf32, #tpu.memory_space<vmem>>, vector<1x128xf32>
    %152 = vector.shape_cast %151 : vector<1x128xf32> to vector<128xf32>
    %153 = vector.shape_cast %152 : vector<128xf32> to vector<1x128xf32>
    %154 = vector.broadcast %153 : vector<1x128xf32> to vector<16x128xf32>
    %155 = arith.addf %150, %154 : vector<16x128xf32>
    %156 = arith.truncf %155 : vector<16x128xf32> to vector<16x128xbf16>
    %c0_55 = arith.constant 0 : index
    %c0_56 = arith.constant 0 : index
    %157 = vector.load %arg9[%c0_55, %c0_56] : memref<128x256xbf16, #tpu.memory_space<vmem>>, vector<128x256xbf16>
    %cst_57 = arith.constant dense<0.000000e+00> : vector<16x256xf32>
    %158 = tpu.matmul %156, %157, %cst_57 {dimension_numbers = #tpu.dot_dimension_numbers<[1], [0], [0], [1], [0, 0, 1, 1], [], []>} : vector<16x128xbf16>, vector<128x256xbf16>, vector<16x256xf32> -> vector<16x256xf32>
    %c0_58 = arith.constant 0 : index
    %c0_59 = arith.constant 0 : index
    %159 = vector.load %arg10[%c0_58, %c0_59] : memref<1x256xf32, #tpu.memory_space<vmem>>, vector<1x256xf32>
    %160 = vector.shape_cast %159 : vector<1x256xf32> to vector<256xf32>
    %161 = vector.shape_cast %160 : vector<256xf32> to vector<1x256xf32>
    %162 = vector.broadcast %161 : vector<1x256xf32> to vector<16x256xf32>
    %163 = arith.addf %158, %162 : vector<16x256xf32>
    %cst_60 = arith.constant 0.000000e+00 : f32
    %164 = vector.broadcast %cst_60 : f32 to vector<16x256xf32>
    %165 = arith.maximumf %163, %164 : vector<16x256xf32>
    %166 = arith.truncf %165 : vector<16x256xf32> to vector<16x256xbf16>
    %c0_61 = arith.constant 0 : index
    %c0_62 = arith.constant 0 : index
    %167 = vector.load %arg11[%c0_61, %c0_62] : memref<256x128xbf16, #tpu.memory_space<vmem>>, vector<256x128xbf16>
    %cst_63 = arith.constant dense<0.000000e+00> : vector<16x128xf32>
    %168 = tpu.matmul %166, %167, %cst_63 {dimension_numbers = #tpu.dot_dimension_numbers<[1], [0], [0], [1], [0, 0, 1, 1], [], []>} : vector<16x256xbf16>, vector<256x128xbf16>, vector<16x128xf32> -> vector<16x128xf32>
    %c0_64 = arith.constant 0 : index
    %c0_65 = arith.constant 0 : index
    %169 = vector.load %arg12[%c0_64, %c0_65] : memref<1x128xf32, #tpu.memory_space<vmem>>, vector<1x128xf32>
    %170 = vector.shape_cast %169 : vector<1x128xf32> to vector<128xf32>
    %171 = vector.shape_cast %170 : vector<128xf32> to vector<1x128xf32>
    %172 = vector.broadcast %171 : vector<1x128xf32> to vector<16x128xf32>
    %173 = arith.addf %168, %172 : vector<16x128xf32>
    %174 = arith.addf %155, %173 : vector<16x128xf32>
    %cst_66 = arith.constant dense<0.000000e+00> : vector<16xf32>
    %175 = vector.multi_reduction <add>, %174, %cst_66 [1] : vector<16x128xf32> to vector<16xf32>
    %176 = vector.shape_cast %175 : vector<16xf32> to vector<16x1xf32>
    %cst_67 = arith.constant 1.280000e+02 : f32
    %177 = vector.broadcast %cst_67 : f32 to vector<16x1xf32>
    %178 = arith.divf %176, %177 : vector<16x1xf32>
    %179 = vector.broadcast %178 : vector<16x1xf32> to vector<16x128xf32>
    %180 = arith.subf %174, %179 : vector<16x128xf32>
    %181 = arith.mulf %180, %180 : vector<16x128xf32>
    %cst_68 = arith.constant dense<0.000000e+00> : vector<16xf32>
    %182 = vector.multi_reduction <add>, %181, %cst_68 [1] : vector<16x128xf32> to vector<16xf32>
    %183 = vector.shape_cast %182 : vector<16xf32> to vector<16x1xf32>
    %cst_69 = arith.constant 1.280000e+02 : f32
    %184 = vector.broadcast %cst_69 : f32 to vector<16x1xf32>
    %185 = arith.divf %183, %184 : vector<16x1xf32>
    %186 = vector.broadcast %178 : vector<16x1xf32> to vector<16x128xf32>
    %187 = arith.subf %174, %186 : vector<16x128xf32>
    %cst_70 = arith.constant 9.99999974E-6 : f32
    %188 = vector.broadcast %cst_70 : f32 to vector<16x1xf32>
    %189 = arith.addf %185, %188 : vector<16x1xf32>
    %190 = math.rsqrt %189 : vector<16x1xf32>
    %191 = vector.broadcast %190 : vector<16x1xf32> to vector<16x128xf32>
    %192 = arith.mulf %187, %191 : vector<16x128xf32>
    %c0_71 = arith.constant 0 : index
    %c0_72 = arith.constant 0 : index
    %193 = vector.load %arg15[%c0_71, %c0_72] : memref<1x128xf32, #tpu.memory_space<vmem>>, vector<1x128xf32>
    %194 = vector.shape_cast %193 : vector<1x128xf32> to vector<128xf32>
    %195 = vector.shape_cast %194 : vector<128xf32> to vector<1x128xf32>
    %196 = vector.broadcast %195 : vector<1x128xf32> to vector<16x128xf32>
    %197 = arith.mulf %192, %196 : vector<16x128xf32>
    %c0_73 = arith.constant 0 : index
    %c0_74 = arith.constant 0 : index
    %198 = vector.load %arg16[%c0_73, %c0_74] : memref<1x128xf32, #tpu.memory_space<vmem>>, vector<1x128xf32>
    %199 = vector.shape_cast %198 : vector<1x128xf32> to vector<128xf32>
    %200 = vector.shape_cast %199 : vector<128xf32> to vector<1x128xf32>
    %201 = vector.broadcast %200 : vector<1x128xf32> to vector<16x128xf32>
    %202 = arith.addf %197, %201 : vector<16x128xf32>
    %c0_75 = arith.constant 0 : index
    %c0_76 = arith.constant 0 : index
    %c0_77 = arith.constant 0 : index
    %203 = vector.load %arg17[%c0_75, %c0_76, %c0_77] : memref<1x16x128xf32, #tpu.memory_space<vmem>>, vector<1x16x128xf32>
    %204 = vector.shape_cast %203 : vector<1x16x128xf32> to vector<16x128xf32>
    %205 = vector.shape_cast %202 : vector<16x128xf32> to vector<1x16x128xf32>
    tpu.vector_store %arg17[%c0_75, %c0_76, %c0_77], %205 {strides = array<i32>} : memref<1x16x128xf32, #tpu.memory_space<vmem>>, vector<1x16x128xf32>,
    return
  }
  func.func @transform_0(%arg0: i32) -> (i32, i32, i32) {
    %c0_i32 = arith.constant 0 : i32
    %c0_i32_0 = arith.constant 0 : i32
    %c0_i32_1 = arith.constant 0 : i32
    return %arg0, %c0_i32, %c0_i32_0 : i32, i32, i32
  }
  func.func @transform_1(%arg0: i32) -> (i32, i32, i32) {
    %c0_i32 = arith.constant 0 : i32
    %c0_i32_0 = arith.constant 0 : i32
    %c0_i32_1 = arith.constant 0 : i32
    return %arg0, %c0_i32, %c0_i32_0 : i32, i32, i32
  }
  func.func @transform_2(%arg0: i32) -> (i32, i32) {
    %c0_i32 = arith.constant 0 : i32
    %c0_i32_0 = arith.constant 0 : i32
    %c0_i32_1 = arith.constant 0 : i32
    return %c0_i32, %c0_i32_0 : i32, i32
  }
  func.func @transform_3(%arg0: i32) -> (i32, i32) {
    %c0_i32 = arith.constant 0 : i32
    %c0_i32_0 = arith.constant 0 : i32
    %c0_i32_1 = arith.constant 0 : i32
    return %c0_i32, %c0_i32_0 : i32, i32
  }
  func.func @transform_4(%arg0: i32) -> (i32, i32) {
    %c0_i32 = arith.constant 0 : i32
    %c0_i32_0 = arith.constant 0 : i32
    %c0_i32_1 = arith.constant 0 : i32
    return %c0_i32, %c0_i32_0 : i32, i32
  }
  func.func @transform_5(%arg0: i32) -> (i32, i32) {
    %c0_i32 = arith.constant 0 : i32
    %c0_i32_0 = arith.constant 0 : i32
    %c0_i32_1 = arith.constant 0 : i32
    return %c0_i32, %c0_i32_0 : i32, i32
  }
  func.func @transform_6(%arg0: i32) -> (i32, i32, i32) {
    %c0_i32 = arith.constant 0 : i32
    %c0_i32_0 = arith.constant 0 : i32
    %c0_i32_1 = arith.constant 0 : i32
    %c0_i32_2 = arith.constant 0 : i32
    return %c0_i32, %c0_i32_0, %c0_i32_1 : i32, i32, i32
  }
  func.func @transform_7(%arg0: i32) -> (i32, i32) {
    %c0_i32 = arith.constant 0 : i32
    %c0_i32_0 = arith.constant 0 : i32
    %c0_i32_1 = arith.constant 0 : i32
    return %c0_i32, %c0_i32_0 : i32, i32
  }
  func.func @transform_8(%arg0: i32) -> (i32, i32) {
    %c0_i32 = arith.constant 0 : i32
    %c0_i32_0 = arith.constant 0 : i32
    %c0_i32_1 = arith.constant 0 : i32
    return %c0_i32, %c0_i32_0 : i32, i32
  }
  func.func @transform_9(%arg0: i32) -> (i32, i32) {
    %c0_i32 = arith.constant 0 : i32
    %c0_i32_0 = arith.constant 0 : i32
    %c0_i32_1 = arith.constant 0 : i32
    return %c0_i32, %c0_i32_0 : i32, i32
  }
  func.func @transform_10(%arg0: i32) -> (i32, i32) {
    %c0_i32 = arith.constant 0 : i32
    %c0_i32_0 = arith.constant 0 : i32
    %c0_i32_1 = arith.constant 0 : i32
    return %c0_i32, %c0_i32_0 : i32, i32
  }
  func.func @transform_11(%arg0: i32) -> (i32, i32) {
    %c0_i32 = arith.constant 0 : i32
    %c0_i32_0 = arith.constant 0 : i32
    %c0_i32_1 = arith.constant 0 : i32
    return %c0_i32, %c0_i32_0 : i32, i32
  }
  func.func @transform_12(%arg0: i32) -> (i32, i32) {
    %c0_i32 = arith.constant 0 : i32
    %c0_i32_0 = arith.constant 0 : i32
    %c0_i32_1 = arith.constant 0 : i32
    return %c0_i32, %c0_i32_0 : i32, i32
  }
  func.func @transform_13(%arg0: i32) -> (i32, i32) {
    %c0_i32 = arith.constant 0 : i32
    %c0_i32_0 = arith.constant 0 : i32
    %c0_i32_1 = arith.constant 0 : i32
    return %c0_i32, %c0_i32_0 : i32, i32
  }
  func.func @transform_14(%arg0: i32) -> (i32, i32) {
    %c0_i32 = arith.constant 0 : i32
    %c0_i32_0 = arith.constant 0 : i32
    %c0_i32_1 = arith.constant 0 : i32
    return %c0_i32, %c0_i32_0 : i32, i32
  }
  func.func @transform_15(%arg0: i32) -> (i32, i32) {
    %c0_i32 = arith.constant 0 : i32
    %c0_i32_0 = arith.constant 0 : i32
    %c0_i32_1 = arith.constant 0 : i32
    return %c0_i32, %c0_i32_0 : i32, i32
  }
  func.func @transform_16(%arg0: i32) -> (i32, i32, i32) {
    %c0_i32 = arith.constant 0 : i32
    %c0_i32_0 = arith.constant 0 : i32
    %c0_i32_1 = arith.constant 0 : i32
    return %arg0, %c0_i32, %c0_i32_0 : i32, i32, i32
  }
}

</mosaic_0001>

<bundles_post_ra>
// kernel: tpu_custom_call.1
= control target key start
LH: loop header
LB: loop body
LE: loop exit
PB: predicated region body
PF: predicated region fallthrough
CT: control target
= control target key end

     0   :  { %s4622_s0 = inlined_call_operand.hbm [shape: f32[2,16,128], index: 0, kind: input, shape index: {}]   ;;  %s4623_s1 = inlined_call_operand.hbm [shape: f32[2,16,128], index: 1, kind: input, shape index: {}]   ;;  %s4624_s2 = inlined_call_operand.hbm [shape: bf16[128,256], index: 2, kind: input, shape index: {}]   ;;  %s4625_s3 = inlined_call_operand.hbm [shape: f32[1,256], index: 3, kind: input, shape index: {}]   ;;  %s4626_s4 = inlined_call_operand.hbm [shape: bf16[128,128], index: 4, kind: input, shape index: {}]   ;;  %s4627_s5 = inlined_call_operand.hbm [shape: f32[1,128], index: 5, kind: input, shape index: {}]   ;;  %s4628_s6 = inlined_call_operand.hbm [shape: bf16[4,32,128], index: 6, kind: input, shape index: {}]   ;;  %s4629_s7 = inlined_call_operand.hbm [shape: f32[1,128], index: 7, kind: input, shape index: {}]   ;;  %s4630_s8 = inlined_call_operand.hbm [shape: bf16[128,256], index: 8, kind: input, shape index: {}]   ;;  %s4631_s9 = inlined_call_operand.hbm [shape: f32[1,256], index: 9, kind: input, shape index: {}]   ;;  %s4632_s10 = inlined_call_operand.hbm [shape: bf16[256,128], index: 10, kind: input, shape index: {}]   ;;  %s4633_s11 = inlined_call_operand.hbm [shape: f32[1,128], index: 11, kind: input, shape index: {}]   ;;  %s4634_s12 = inlined_call_operand.hbm [shape: f32[1,128], index: 12, kind: input, shape index: {}]   ;;  %s4635_s13 = inlined_call_operand.hbm [shape: f32[1,128], index: 13, kind: input, shape index: {}]   ;;  %s4636_s14 = inlined_call_operand.hbm [shape: f32[1,128], index: 14, kind: input, shape index: {}]   ;;  %s4637_s15 = inlined_call_operand.hbm [shape: f32[1,128], index: 15, kind: input, shape index: {}]   ;;  %s4638_s16 = inlined_call_operand.hbm [shape: f32[2,16,128], index: 16, kind: output, shape index: {}]  }
   0x1   :  { %4657 = sst [smem:[#allocation45_spill]] %s4622_s0 }
   0x2   :  { %4658 = sst [smem:[#allocation46_spill]] %s4623_s1 }
   0x3   :  { %4659 = sst [smem:[#allocation47_spill]] %s4624_s2 }
   0x4   :  { %4660 = sst [smem:[#allocation48_spill]] %s4625_s3 }
   0x5   :  { %4661 = sst [smem:[#allocation49_spill]] %s4626_s4 }
   0x6   :  { %4662 = sst [smem:[#allocation50_spill]] %s4627_s5 }
   0x7   :  { %4663 = sst [smem:[#allocation51_spill]] %s4628_s6 }
   0x8   :  { %4664 = sst [smem:[#allocation52_spill]] %s4629_s7 }
   0x9   :  { %4665 = sst [smem:[#allocation53_spill]] %s4630_s8 }
   0xa   :  { %4666 = sst [smem:[#allocation54_spill]] %s4631_s9 }
   0xb   :  { %4667 = sst [smem:[#allocation55_spill]] %s4638_s16 }
   0xc   :  { %21 = vsyncpa [#allocation3], 0 }
   0xd   :  { %23 = vsyncpa [#allocation3 + $0x1], 0 }
   0xe   :  { %24 = vsyncpa [#allocation6], 0 }
   0xf   :  { %26 = vsyncpa [#allocation6 + $0x1], 0 }
  0x10   :  { %27 = vsyncpa [#allocation9], 0 }
  0x11   :  { %28 = vsyncpa [#allocation12], 0 }
  0x12   :  { %29 = vsyncpa [#allocation15], 0 }
  0x13   :  { %30 = vsyncpa [#allocation18], 0 }
  0x14   :  { %31 = vsyncpa [#allocation21], 0 }
  0x15   :  { %32 = vsyncpa [#allocation24], 0 }
  0x16   :  { %33 = vsyncpa [#allocation27], 0 }
  0x17   :  { %34 = vsyncpa [#allocation4], 0 }
  0x18   :  { %36 = vsyncpa [#allocation4 + $0x1], 0  ;;  %s3884_s21 = smov 0   ;;  %s3886_s22 = smov 0  }
  0x19   :  { %s3888_s23 = smov 0   ;;  %s3890_s24 = smov 0  }
  0x1a LB: > { %4668 = sst [smem:[#allocation40_spill]] %s3756_s21  ;;  %s3770_s25 = smov [#allocation7]   ;;  %s3768_s24 = sphi %s3890_s24, %s4729_s24   ;;  %s3764_s23 = sphi %s3888_s23, %s4728_s23   ;;  %s3760_s22 = sphi %s3886_s22, %s4725_s22   ;;  %s3756_s21 = sphi %s3884_s21, %s4727_s21  }
  0x1b   : > { %4669 = sst [smem:[#allocation41_spill]] %s3760_s22  ;;  %s431_s26 = sshll.u32 %s3770_s25, 4  ;;  %s3910_s26 = int_to_ptr.vmem [resolvable:$true] %s431_s26 }
  0x1c   : > { %4670 = sst [smem:[#allocation42_spill]] %s3764_s23  ;;  %s3905_s27 = sadd.s32 4294967295, %s3768_s24  }
  0x1d   : > { %4671 = sst [smem:[#allocation43_spill]] %s3905_s27  ;;  %p2583_p0 = scmp.ge.s32.totalorder %s3768_s24, 1 }
  0x1e   : > { %p4650_p1 = scmp.eq.s32.totalorder %s3905_s27, 0  ;;  %p419_p2 = scmp.lt.s32.totalorder %s3768_s24, 3 }
  0x1f   : > { %s3771_s29 = smov [#allocation8]   ;;  %s3772_s17 = smov [#allocation11]  }
  0x20   : > { %p3912_p3 = pnand %p2583_p0, %p419_p2  ;;  %s445_s30 = sshll.u32 %s3771_s29, 4  ;;  %s3925_s30 = int_to_ptr.vmem [resolvable:$true] %s445_s30 }
  0x21   : > { %s469_s18 = sshll.u32 %s3772_s17, 4  ;;  %s4675_s2 = sld [smem:[#allocation47_spill]]  ;;  %s3927_s18 = int_to_ptr.vmem [resolvable:$true] %s469_s18 }
  0x22   : > { %s4672_s28 = scalar_select %p3912_p3, 1, 0 }
  0x23   : > { %p2947_p5 = pneg %p3912_p3 }
  0x24   : > { %4673 = sst [smem:[#allocation44_spill]] %s4672_s28 }
  0x25   : > { %p3921_p6 = pnand %p2947_p5, %p4650_p1 }
  0x27   : > { %s3214_s25 = scalar_lea.hbm %s4675_s2, 2048  ;;  %p3937_p8 = pneg %p3921_p6 }
  0x28   : > { %p3215_p7 = scmp.ne.s32.totalorder %s4675_s2, %s3214_s25  ;;  %p3221_p11 = scmp.lt.u32.totalorder %s3214_s25, %s4675_s2 }
  0x2a   : > { %p3217_p9 = pnand %p3937_p8, %p3215_p7 }
  0x2c   : > { %p3218_p10 = pneg %p3217_p9 }
  0x2e   : > { %p3223_p12 = pnand %p3221_p11, %p3218_p10 }
  0x30   : > { %3226 = shalt.err (!%p3223_p12)
}
  0x31   : > { %s3227_s16 = scalar_lea.vmem %s3910_s26, 2048  ;;  %p3235_p5 = scmp.lt.s32.totalorder %s3910_s26, %s3910_s26 }
  0x32   : > { %p3228_p13 = scmp.ne.s32.totalorder %s3910_s26, %s3227_s16  ;;  %p3236_p4 = scmp.lt.s32.totalorder %s3227_s16, %s3227_s16 }
  0x34   : > { %p3230_p0 = pnand %p3228_p13, %p3937_p8  ;;  %p3237_p7 = por %p3236_p4, %p3235_p5 }
  0x36   : > { %p3231_p2 = pneg %p3230_p0 }
  0x38   : > { %p3238_p9 = pnand %p3237_p7, %p3231_p2 }
  0x3a   : > { %3241 = shalt.err (!%p3238_p9)
}
  0x3b   : > { %s4648_s28 = smov 128   ;;  %s4652_s1 = smov 8  }
  0x3c   : > { %2950 = dma.hbm_to_vmem [thread:$0]  (!%p3921_p6), %s4675_s2, 2048, %s3910_s26, [#allocation6], %s4648_s28, %s4648_s28, %s4652_s1  }
  0x3d   : > { %s4677_s3 = sld [smem:[#allocation48_spill]] }
  0x43   : > { %s3242_s16 = scalar_lea.hbm %s4677_s3, 32 }
  0x44   : > { %p3243_p4 = scmp.ne.s32.totalorder %s4677_s3, %s3242_s16  ;;  %p3249_p12 = scmp.lt.u32.totalorder %s3242_s16, %s4677_s3 }
  0x46   : > { %p3245_p10 = pnand %p3243_p4, %p3937_p8 }
  0x48   : > { %p3246_p11 = pneg %p3245_p10 }
  0x4a   : > { %p3251_p13 = pnand %p3249_p12, %p3246_p11 }
  0x4c   : > { %3254 = shalt.err (!%p3251_p13)
}
  0x4d   : > { %s3255_s26 = scalar_lea.vmem %s3925_s30, 32  ;;  %p3263_p7 = scmp.lt.s32.totalorder %s3925_s30, %s3925_s30 }
  0x4e   : > { %p3256_p0 = scmp.ne.s32.totalorder %s3925_s30, %s3255_s26  ;;  %p3264_p9 = scmp.lt.s32.totalorder %s3255_s26, %s3255_s26 }
  0x50   : > { %p3258_p2 = pnand %p3256_p0, %p3937_p8  ;;  %p3265_p4 = por %p3264_p9, %p3263_p7 }
  0x52   : > { %p3259_p5 = pneg %p3258_p2 }
  0x54   : > { %p3266_p10 = pnand %p3265_p4, %p3259_p5 }
  0x56   : > { %3269 = shalt.err (!%p3266_p10)
}
  0x57   : > { %2953 = dma.hbm_to_vmem [thread:$0]  (!%p3921_p6), %s4677_s3, 32, %s3925_s30, [#allocation9]  }
  0x58   : > { %s4678_s5 = sld [smem:[#allocation50_spill]] }
  0x5e   : > { %s3270_s19 = scalar_lea.hbm %s4678_s5, 16 }
  0x5f   : > { %p3271_p11 = scmp.ne.s32.totalorder %s4678_s5, %s3270_s19  ;;  %p3277_p0 = scmp.lt.u32.totalorder %s3270_s19, %s4678_s5 }
  0x61   : > { %p3273_p12 = pnand %p3271_p11, %p3937_p8 }
  0x63   : > { %p3274_p13 = pneg %p3273_p12 }
  0x65   : > { %p3279_p2 = pnand %p3277_p0, %p3274_p13 }
  0x67   : > { %3282 = shalt.err (!%p3279_p2)
}
  0x68   : > { %s3283_s30 = scalar_lea.vmem %s3927_s18, 16  ;;  %s3290_s26 = scalar_lea.vmem %s3927_s18, 32 }
  0x69   : > { %p3284_p5 = scmp.ne.s32.totalorder %s3927_s18, %s3283_s30  ;;  %p3291_p4 = scmp.lt.s32.totalorder %s3927_s18, %s3927_s18 }
  0x6a   : > { %p3292_p10 = scmp.lt.s32.totalorder %s3290_s26, %s3283_s30 }
  0x6b   : > { %p3286_p7 = pnand %p3284_p5, %p3937_p8 }
  0x6c   : > { %p3293_p11 = por %p3292_p10, %p3291_p4 }
  0x6d   : > { %p3287_p9 = pneg %p3286_p7 }
  0x6f   : > { %p3294_p12 = pnand %p3293_p11, %p3287_p9 }
  0x71   : > { %3297 = shalt.err (!%p3294_p12)
}
  0x72   : > { %2959 = dma.hbm_to_vmem [thread:$0]  (!%p3921_p6), %s4678_s5, 16, %s3927_s18, [#allocation12]  }
  0x73   : > { %s3775_s23 = smov [#allocation14]   ;;  %s3776_s19 = smov [#allocation17]  }
  0x74   : > { %s493_s27 = sshll.u32 %s3775_s23, 4  ;;  %s517_s20 = sshll.u32 %s3776_s19, 4  ;;  %s494_s27 = int_to_ptr.vmem [resolvable:$true] %s493_s27  ;;  %s518_s20 = int_to_ptr.vmem [resolvable:$true] %s517_s20 }
  0x75   : > { %s4679_s7 = sld [smem:[#allocation52_spill]] }
  0x7b   : > { %s3298_s16 = scalar_lea.hbm %s4679_s7, 16 }
  0x7c   : > { %p3299_p13 = scmp.ne.s32.totalorder %s4679_s7, %s3298_s16  ;;  %p3305_p5 = scmp.lt.u32.totalorder %s3298_s16, %s4679_s7 }
  0x7e   : > { %p3301_p0 = pnand %p3299_p13, %p3937_p8 }
  0x80   : > { %p3302_p2 = pneg %p3301_p0 }
  0x82   : > { %p3307_p7 = pnand %p3305_p5, %p3302_p2 }
  0x84   : > { %3310 = shalt.err (!%p3307_p7)
}
  0x85   : > { %s3311_s18 = scalar_lea.vmem %s494_s27, 16  ;;  %s3318_s22 = scalar_lea.vmem %s494_s27, 32 }
  0x86   : > { %p3312_p9 = scmp.ne.s32.totalorder %s494_s27, %s3311_s18  ;;  %p3319_p11 = scmp.lt.s32.totalorder %s494_s27, %s494_s27 }
  0x87   : > { %p3320_p12 = scmp.lt.s32.totalorder %s3318_s22, %s3311_s18 }
  0x88   : > { %p3314_p4 = pnand %p3312_p9, %p3937_p8 }
  0x89   : > { %p3321_p1 = por %p3320_p12, %p3319_p11 }
  0x8a   : > { %p3315_p10 = pneg %p3314_p4 }
  0x8c   : > { %p3322_p3 = pnand %p3321_p1, %p3315_p10 }
  0x8e   : > { %3325 = shalt.err (!%p3322_p3)
}
  0x8f   : > { %2965 = dma.hbm_to_vmem [thread:$0]  (!%p3921_p6), %s4679_s7, 16, %s494_s27, [#allocation15]  }
  0x90   : > { %s4680_s9 = sld [smem:[#allocation54_spill]] }
  0x96   : > { %s3326_s17 = scalar_lea.hbm %s4680_s9, 32 }
  0x97   : > { %p3327_p13 = scmp.ne.s32.totalorder %s4680_s9, %s3326_s17  ;;  %p3333_p3 = scmp.lt.u32.totalorder %s3326_s17, %s4680_s9 }
  0x99   : > { %p3329_p0 = pnand %p3327_p13, %p3937_p8 }
  0x9b   : > { %p3330_p1 = pneg %p3329_p0 }
  0x9d   : > { %p3335_p2 = pnand %p3333_p3, %p3330_p1 }
  0x9f   : > { %3338 = shalt.err (!%p3335_p2)
}
  0xa0   : > { %s3339_s18 = scalar_lea.vmem %s518_s20, 32  ;;  %p3347_p4 = scmp.lt.s32.totalorder %s518_s20, %s518_s20 }
  0xa1   : > { %p3340_p5 = scmp.ne.s32.totalorder %s518_s20, %s3339_s18  ;;  %p3348_p10 = scmp.lt.s32.totalorder %s3339_s18, %s3339_s18 }
  0xa3   : > { %p3342_p7 = pnand %p3340_p5, %p3937_p8  ;;  %p3349_p11 = por %p3348_p10, %p3347_p4 }
  0xa5   : > { %p3343_p9 = pneg %p3342_p7 }
  0xa7   : > { %p3350_p12 = pnand %p3349_p11, %p3343_p9 }
  0xa9   : > { %3353 = shalt.err (!%p3350_p12)
}
  0xaa   : > { %2971 = dma.hbm_to_vmem [thread:$0]  (!%p3921_p6), %s4680_s9, 32, %s518_s20, [#allocation18]  }
  0xab   : > { %s3777_s23 = smov [#allocation20]   ;;  %s3778_s28 = smov [#allocation23]  }
  0xac   : > { %s541_s19 = sshll.u32 %s3777_s23, 4  ;;  %s563_s25 = sshll.u32 %s3778_s28, 4  ;;  %s542_s19 = int_to_ptr.vmem [resolvable:$true] %s541_s19  ;;  %s564_s25 = int_to_ptr.vmem [resolvable:$true] %s563_s25 }
  0xad   : > { %s3354_s30 = scalar_lea.hbm %s4633_s11, 16 }
  0xae   : > { %p3355_p13 = scmp.ne.s32.totalorder %s4633_s11, %s3354_s30  ;;  %p3361_p3 = scmp.lt.u32.totalorder %s3354_s30, %s4633_s11 }
  0xb0   : > { %p3357_p0 = pnand %p3355_p13, %p3937_p8 }
  0xb2   : > { %p3358_p1 = pneg %p3357_p0 }
  0xb4   : > { %p3363_p2 = pnand %p3361_p3, %p3358_p1 }
  0xb6   : > { %3366 = shalt.err (!%p3363_p2)
}
  0xb7   : > { %s3367_s20 = scalar_lea.vmem %s542_s19, 16  ;;  %s3374_s22 = scalar_lea.vmem %s542_s19, 32 }
  0xb8   : > { %p3368_p5 = scmp.ne.s32.totalorder %s542_s19, %s3367_s20  ;;  %p3375_p4 = scmp.lt.s32.totalorder %s542_s19, %s542_s19 }
  0xb9   : > { %p3376_p10 = scmp.lt.s32.totalorder %s3374_s22, %s3367_s20 }
  0xba   : > { %p3370_p7 = pnand %p3368_p5, %p3937_p8 }
  0xbb   : > { %p3377_p11 = por %p3376_p10, %p3375_p4 }
  0xbc   : > { %p3371_p9 = pneg %p3370_p7 }
  0xbe   : > { %p3378_p12 = pnand %p3377_p11, %p3371_p9 }
  0xc0   : > { %3381 = shalt.err (!%p3378_p12)
}
  0xc1   : > { %2977 = dma.hbm_to_vmem [thread:$0]  (!%p3921_p6), %s4633_s11, 16, %s542_s19, [#allocation21]  }
  0xc2   : > { %s3382_s30 = scalar_lea.hbm %s4635_s13, 16 }
  0xc3   : > { %p3383_p13 = scmp.ne.s32.totalorder %s4635_s13, %s3382_s30  ;;  %p3389_p3 = scmp.lt.u32.totalorder %s3382_s30, %s4635_s13 }
  0xc5   : > { %p3385_p0 = pnand %p3383_p13, %p3937_p8 }
  0xc7   : > { %p3386_p1 = pneg %p3385_p0 }
  0xc9   : > { %p3391_p2 = pnand %p3389_p3, %p3386_p1 }
  0xcb   : > { %3394 = shalt.err (!%p3391_p2)
}
  0xcc   : > { %s3395_s20 = scalar_lea.vmem %s564_s25, 16  ;;  %s3402_s19 = scalar_lea.vmem %s564_s25, 32 }
  0xcd   : > { %p3396_p5 = scmp.ne.s32.totalorder %s564_s25, %s3395_s20  ;;  %p3403_p4 = scmp.lt.s32.totalorder %s564_s25, %s564_s25 }
  0xce   : > { %p3404_p10 = scmp.lt.s32.totalorder %s3402_s19, %s3395_s20 }
  0xcf   : > { %p3398_p7 = pnand %p3396_p5, %p3937_p8 }
  0xd0   : > { %p3405_p11 = por %p3404_p10, %p3403_p4 }
  0xd1   : > { %p3399_p9 = pneg %p3398_p7 }
  0xd3   : > { %p3406_p12 = pnand %p3405_p11, %p3399_p9 }
  0xd5   : > { %3409 = shalt.err (!%p3406_p12)
}
  0xd6   : > { %2983 = dma.hbm_to_vmem [thread:$0]  (!%p3921_p6), %s4635_s13, 16, %s564_s25, [#allocation24]  }
  0xd7   : > { %s3779_s28 = smov [#allocation10]   ;;  %s4681_s4 = sld [smem:[#allocation49_spill]] }
  0xd8   : > { %s455_s17 = sshll.u32 %s3779_s28, 4  ;;  %s456_s17 = int_to_ptr.vmem [resolvable:$true] %s455_s17 }
  0xdd   : > { %s3410_s26 = scalar_lea.hbm %s4681_s4, 1024 }
  0xde   : > { %p3411_p13 = scmp.ne.s32.totalorder %s4681_s4, %s3410_s26  ;;  %p3417_p3 = scmp.lt.u32.totalorder %s3410_s26, %s4681_s4 }
  0xe0   : > { %p3413_p0 = pnand %p3411_p13, %p3937_p8 }
  0xe2   : > { %p3414_p1 = pneg %p3413_p0 }
  0xe4   : > { %p3419_p2 = pnand %p3417_p3, %p3414_p1 }
  0xe6   : > { %3422 = shalt.err (!%p3419_p2)
}
  0xe7   : > { %s3423_s25 = scalar_lea.vmem %s456_s17, 1024  ;;  %p3431_p4 = scmp.lt.s32.totalorder %s456_s17, %s456_s17 }
  0xe8   : > { %p3424_p5 = scmp.ne.s32.totalorder %s456_s17, %s3423_s25  ;;  %p3432_p10 = scmp.lt.s32.totalorder %s3423_s25, %s3423_s25 }
  0xea   : > { %p3426_p7 = pnand %p3424_p5, %p3937_p8  ;;  %p3433_p11 = por %p3432_p10, %p3431_p4 }
  0xec   : > { %p3427_p9 = pneg %p3426_p7 }
  0xee   : > { %p3434_p12 = pnand %p3433_p11, %p3427_p9 }
  0xf0   : > { %3437 = shalt.err (!%p3434_p12)
}
  0xf1   : > { %s4654_s19 = smov 64   ;;  %s4655_s22 = smov 4  }
  0xf2   : > { %2956 = dma.hbm_to_vmem [thread:$0]  (!%p3921_p6), %s4681_s4, 1024, %s456_s17, [#allocation9], %s4654_s19, %s4654_s19, %s4655_s22  }
  0xf3   : > { %s3782_s16 = smov [#allocation13]   ;;  %s3783_s26 = smov [#allocation16]  }
  0xf4   : > { %s479_s30 = sshll.u32 %s3782_s16, 4  ;;  %s503_s21 = sshll.u32 %s3783_s26, 4  ;;  %s480_s30 = int_to_ptr.vmem [resolvable:$true] %s479_s30  ;;  %s4101_s21 = int_to_ptr.vmem [resolvable:$true] %s503_s21 }
  0xf5   : > { %s4682_s6 = sld [smem:[#allocation51_spill]] }
  0xfb   : > { %s3438_s20 = scalar_lea.hbm %s4682_s6, 1024 }
  0xfc   : > { %p3439_p13 = scmp.ne.s32.totalorder %s4682_s6, %s3438_s20  ;;  %p3445_p3 = scmp.lt.u32.totalorder %s3438_s20, %s4682_s6 }
  0xfe   : > { %p3441_p0 = pnand %p3439_p13, %p3937_p8 }
 0x100   : > { %p3442_p1 = pneg %p3441_p0 }
 0x102   : > { %p3447_p2 = pnand %p3445_p3, %p3442_p1 }
 0x104   : > { %3450 = shalt.err (!%p3447_p2)
}
 0x105   : > { %s3451_s28 = scalar_lea.vmem %s480_s30, 1024  ;;  %p3459_p4 = scmp.lt.s32.totalorder %s480_s30, %s480_s30 }
 0x106   : > { %p3452_p5 = scmp.ne.s32.totalorder %s480_s30, %s3451_s28  ;;  %p3460_p10 = scmp.lt.s32.totalorder %s3451_s28, %s3451_s28 }
 0x108   : > { %p3454_p7 = pnand %p3452_p5, %p3937_p8  ;;  %p3461_p11 = por %p3460_p10, %p3459_p4 }
 0x10a   : > { %p3455_p9 = pneg %p3454_p7 }
 0x10c   : > { %p3462_p12 = pnand %p3461_p11, %p3455_p9 }
 0x10e   : > { %3465 = shalt.err (!%p3462_p12)
}
 0x10f   : > { %2962 = dma.hbm_to_vmem [thread:$0]  (!%p3921_p6), %s4682_s6, 1024, %s480_s30, [#allocation12], %s4654_s19, %s4654_s19, %s4655_s22  }
 0x110   : > { %s4683_s8 = sld [smem:[#allocation53_spill]] }
 0x116   : > { %s3466_s27 = scalar_lea.hbm %s4683_s8, 2048 }
 0x117   : > { %p3467_p13 = scmp.ne.s32.totalorder %s4683_s8, %s3466_s27  ;;  %p3473_p3 = scmp.lt.u32.totalorder %s3466_s27, %s4683_s8 }
 0x119   : > { %p3469_p0 = pnand %p3467_p13, %p3937_p8 }
 0x11b   : > { %p3470_p1 = pneg %p3469_p0 }
 0x11d   : > { %p3475_p2 = pnand %p3473_p3, %p3470_p1 }
 0x11f   : > { %3478 = shalt.err (!%p3475_p2)
}
 0x120   : > { %s3479_s30 = scalar_lea.vmem %s4101_s21, 2048  ;;  %p3487_p4 = scmp.lt.s32.totalorder %s4101_s21, %s4101_s21 }
 0x121   : > { %p3480_p5 = scmp.ne.s32.totalorder %s4101_s21, %s3479_s30  ;;  %p3488_p10 = scmp.lt.s32.totalorder %s3479_s30, %s3479_s30 }
 0x123   : > { %p3482_p7 = pnand %p3480_p5, %p3937_p8  ;;  %p3489_p11 = por %p3488_p10, %p3487_p4 }
 0x125   : > { %p3483_p9 = pneg %p3482_p7 }
 0x127   : > { %p3490_p12 = pnand %p3489_p11, %p3483_p9 }
 0x129   : > { %3493 = shalt.err (!%p3490_p12)
}
 0x12a   : > { %s4684_s28 = smov 8   ;;  %s4685_s1 = smov 128  }
 0x12b   : > { %2968 = dma.hbm_to_vmem [thread:$0]  (!%p3921_p6), %s4683_s8, 2048, %s4101_s21, [#allocation15], %s4685_s1, %s4685_s1, %s4684_s28  }
 0x12c   : > { %s3784_s18 = smov [#allocation19]   ;;  %s3785_s20 = smov [#allocation22]  }
 0x12d   : > { %s527_s27 = sshll.u32 %s3784_s18, 4  ;;  %s552_s25 = sshll.u32 %s3785_s20, 4  ;;  %s528_s27 = int_to_ptr.vmem [resolvable:$true] %s527_s27  ;;  %s4150_s25 = int_to_ptr.vmem [resolvable:$true] %s552_s25 }
 0x12e   : > { %s3494_s30 = scalar_lea.hbm %s4632_s10, 2048 }
 0x12f   : > { %p3495_p13 = scmp.ne.s32.totalorder %s4632_s10, %s3494_s30  ;;  %p3501_p3 = scmp.lt.u32.totalorder %s3494_s30, %s4632_s10 }
 0x131   : > { %p3497_p0 = pnand %p3495_p13, %p3937_p8 }
 0x133   : > { %p3498_p1 = pneg %p3497_p0 }
 0x135   : > { %p3503_p2 = pnand %p3501_p3, %p3498_p1 }
 0x137   : > { %3506 = shalt.err (!%p3503_p2)
}
 0x138   : > { %s3507_s26 = scalar_lea.vmem %s528_s27, 2048  ;;  %p3515_p4 = scmp.lt.s32.totalorder %s528_s27, %s528_s27 }
 0x139   : > { %p3508_p5 = scmp.ne.s32.totalorder %s528_s27, %s3507_s26  ;;  %p3516_p10 = scmp.lt.s32.totalorder %s3507_s26, %s3507_s26 }
 0x13b   : > { %p3510_p7 = pnand %p3508_p5, %p3937_p8  ;;  %p3517_p11 = por %p3516_p10, %p3515_p4 }
 0x13d   : > { %p3511_p9 = pneg %p3510_p7 }
 0x13f   : > { %p3518_p12 = pnand %p3517_p11, %p3511_p9 }
 0x141   : > { %3521 = shalt.err (!%p3518_p12)
}
 0x142   : > { %s4686_s19 = smov 4   ;;  %s4687_s22 = smov 64  }
 0x143   : > { %2974 = dma.hbm_to_vmem [thread:$0]  (!%p3921_p6), %s4632_s10, 2048, %s528_s27, [#allocation18], %s4687_s22, %s4687_s22, %s4686_s19  }
 0x144   : > { %s3522_s30 = scalar_lea.hbm %s4634_s12, 16 }
 0x145   : > { %p3523_p13 = scmp.ne.s32.totalorder %s4634_s12, %s3522_s30  ;;  %p3529_p3 = scmp.lt.u32.totalorder %s3522_s30, %s4634_s12 }
 0x147   : > { %p3525_p0 = pnand %p3523_p13, %p3937_p8 }
 0x149   : > { %p3526_p1 = pneg %p3525_p0 }
 0x14b   : > { %p3531_p2 = pnand %p3529_p3, %p3526_p1 }
 0x14d   : > { %3534 = shalt.err (!%p3531_p2)
}
 0x14e   : > { %s3535_s27 = scalar_lea.vmem %s4150_s25, 16  ;;  %s3542_s19 = scalar_lea.vmem %s4150_s25, 32 }
 0x14f   : > { %p3536_p5 = scmp.ne.s32.totalorder %s4150_s25, %s3535_s27  ;;  %p3543_p4 = scmp.lt.s32.totalorder %s4150_s25, %s4150_s25 }
 0x150   : > { %p3544_p10 = scmp.lt.s32.totalorder %s3542_s19, %s3535_s27 }
 0x151   : > { %p3538_p7 = pnand %p3536_p5, %p3937_p8 }
 0x152   : > { %p3545_p11 = por %p3544_p10, %p3543_p4 }
 0x153   : > { %p3539_p9 = pneg %p3538_p7 }
 0x155   : > { %p3546_p12 = pnand %p3545_p11, %p3539_p9 }
 0x157   : > { %3549 = shalt.err (!%p3546_p12)
}
 0x158   : > { %2980 = dma.hbm_to_vmem [thread:$0]  (!%p3921_p6), %s4634_s12, 16, %s4150_s25, [#allocation21]  }
 0x159   : > { %s3786_s18 = smov [#allocation25]   ;;  %s3787_s23 = smov [#allocation26]  }
 0x15a   : > { %s574_s20 = sshll.u32 %s3786_s18, 4  ;;  %s585_s17 = sshll.u32 %s3787_s23, 4  ;;  %s575_s20 = int_to_ptr.vmem [resolvable:$true] %s574_s20  ;;  %s4197_s17 = int_to_ptr.vmem [resolvable:$true] %s585_s17 }
 0x15b   : > { %s3550_s21 = scalar_lea.hbm %s4636_s14, 16 }
 0x15c   : > { %p3551_p13 = scmp.ne.s32.totalorder %s4636_s14, %s3550_s21  ;;  %p3557_p3 = scmp.lt.u32.totalorder %s3550_s21, %s4636_s14 }
 0x15e   : > { %p3553_p0 = pnand %p3551_p13, %p3937_p8 }
 0x160   : > { %p3554_p1 = pneg %p3553_p0 }
 0x162   : > { %p3559_p2 = pnand %p3557_p3, %p3554_p1 }
 0x164   : > { %3562 = shalt.err (!%p3559_p2)
}
 0x165   : > { %s3563_s2 = scalar_lea.vmem %s575_s20, 16  ;;  %s3570_s22 = scalar_lea.vmem %s575_s20, 32 }
 0x166   : > { %p3564_p5 = scmp.ne.s32.totalorder %s575_s20, %s3563_s2  ;;  %p3571_p4 = scmp.lt.s32.totalorder %s575_s20, %s575_s20 }
 0x167   : > { %p3572_p10 = scmp.lt.s32.totalorder %s3570_s22, %s3563_s2 }
 0x168   : > { %p3566_p7 = pnand %p3564_p5, %p3937_p8 }
 0x169   : > { %p3573_p11 = por %p3572_p10, %p3571_p4 }
 0x16a   : > { %p3567_p9 = pneg %p3566_p7 }
 0x16c   : > { %p3574_p12 = pnand %p3573_p11, %p3567_p9 }
 0x16e   : > { %3577 = shalt.err (!%p3574_p12)
}
 0x16f   : > { %2986 = dma.hbm_to_vmem [thread:$0]  (!%p3921_p6), %s4636_s14, 16, %s575_s20, [#allocation24]  }
 0x170   : > { %s3578_s21 = scalar_lea.hbm %s4637_s15, 16 }
 0x171   : > { %p3579_p13 = scmp.ne.s32.totalorder %s4637_s15, %s3578_s21  ;;  %p3585_p3 = scmp.lt.u32.totalorder %s3578_s21, %s4637_s15 }
 0x173   : > { %p3581_p0 = pnand %p3579_p13, %p3937_p8 }
 0x175   : > { %p3582_p1 = pneg %p3581_p0 }
 0x177   : > { %p3587_p2 = pnand %p3585_p3, %p3582_p1 }
 0x179   : > { %3590 = shalt.err (!%p3587_p2)
}
 0x17a   : > { %s3591_s20 = scalar_lea.vmem %s4197_s17, 16  ;;  %s3598_s2 = scalar_lea.vmem %s4197_s17, 32 }
 0x17b   : > { %p3592_p5 = scmp.ne.s32.totalorder %s4197_s17, %s3591_s20  ;;  %p3599_p4 = scmp.lt.s32.totalorder %s4197_s17, %s4197_s17 }
 0x17c   : > { %p3600_p10 = scmp.lt.s32.totalorder %s3598_s2, %s3591_s20 }
 0x17d   : > { %p3594_p7 = pnand %p3592_p5, %p3937_p8 }
 0x17e   : > { %p3601_p11 = por %p3600_p10, %p3599_p4 }
 0x17f   : > { %p3595_p9 = pneg %p3594_p7 }
 0x181   : > { %p3602_p12 = pnand %p3601_p11, %p3595_p9 }
 0x183   : > { %3605 = shalt.err (!%p3602_p12)
}
 0x184   : > { %s4688_s23 = sld [smem:[#allocation42_spill]]  ;;  %s4689_s29 = sld [smem:[#allocation41_spill]] }
 0x185   : > { %s4690_s30 = sld [smem:[#allocation40_spill]]  ;;  %s4691_s16 = sld [smem:[#allocation43_spill]] }
 0x186   : > { %2989 = dma.hbm_to_vmem [thread:$0]  (!%p3921_p6), %s4637_s15, 16, %s4197_s17, [#allocation27]  }
 0x187   : > { %s2582_s0 = sadd.s32 4294967294, %s3768_s24   ;;  %s4243_s21 = sadd.s32 1, %s3768_s24  }
 0x188   : > { %s46_s26 = ssub.s32 %s3768_s24, %s4243_s21  ;;  %p57_p0 = scmp.eq.s32.totalorder %s3768_s24, 0 }
 0x189   : > { %p47_p8 = scmp.eq.s32.totalorder %s46_s26, 0  ;;  %p412_p7 = scmp.eq.s32.totalorder %s2582_s0, 1 }
 0x18a   : > { %s49_s27 = sadd.s32 1, %s4688_s23  ;;  %p56_p13 = scmp.ne.s32.totalorder %s4688_s23, %s4689_s29 }
 0x18b   : > { %p62_p1 = scmp.ne.s32.totalorder %s4689_s29, %s4690_s30  ;;  %p4693_p2 = scmp.eq.s32.totalorder %s4691_s16, 0 }
 0x18c   : > { %s4254_s19 = scalar_select %p47_p8, %s4688_s23, %s49_s27  }
 0x18d   : > { %p4256_p3 = por %p57_p0, %p56_p13  ;;  %p4262_p6 = por %p4693_p2, %p62_p1 }
 0x18e   : > { %p406_p5 = scmp.eq.s32.totalorder %s4691_s16, 1  ;;  %p3015_p9 = scmp.lt.s32.totalorder %s3768_s24, 2 }
 0x18f   : > { %s596_s20 = sand.u32 1, %s4688_s23   ;;  %p4273_p10 = por %p412_p7, %p62_p1 }
 0x190   : > { %p4269_p4 = por %p406_p5, %p56_p13  ;;  %s2599_s18 = sshll.u32 %s596_s20, 4 }
 0x191   : > { %s4696_s22 = scalar_select %p4273_p10, 1, 0 }
 0x192   : > { %s4695_s2 = scalar_select %p4269_p4, 1, 0 }
 0x193   : > { %s2711_s29 = sshll.u32 %s3768_s24, 8  ;;  %s4697_s27 = sld [smem:[#allocation45_spill]] }
 0x194   : > { %s600_s16 = scalar_lea.vmem [#allocation2], %s2599_s18  ;;  %p4287_p11 = pnand %p3015_p9, %p4256_p3 }
 0x195   : > { %s607_s23 = sshll.u32 %s600_s16, 4  ;;  %s4699_s6 = sld [smem:[#allocation46_spill]]  ;;  %s4283_s23 = int_to_ptr.vmem [resolvable:$true] %s607_s23 }
 0x196   : > { %s621_s26 = scalar_lea.vmem [#allocation5], %s2599_s18  ;;  %s4298_s8 = scalar_lea.sflag [#allocation3], %s596_s20 }
 0x197   : > { %s4296_s7 = sshll.u32 %s621_s26, 4  ;;  %p3608_p8 = pneg %p4287_p11  ;;  %s4330_s7 = int_to_ptr.vmem [resolvable:$true] %s4296_s7 }
 0x199   : > { %s4281_s3 = scalar_lea.hbm %s4697_s27, %s2711_s29  ;;  %s3611_s4 = scalar_lea.hbm %s4697_s27, 512 }
 0x19a   : > { %s3606_s16 = scalar_lea.hbm %s4281_s3, 256  ;;  %p3612_p1 = scmp.lt.u32.totalorder %s4281_s3, %s4697_s27 }
 0x19b   : > { %s4294_s30 = scalar_lea.hbm %s4699_s6, %s2711_s29  ;;  %p3607_p12 = scmp.ne.s32.totalorder %s4281_s3, %s3606_s16 }
 0x19c   : > { %p3613_p3 = scmp.lt.u32.totalorder %s3611_s4, %s3606_s16  ;;  %p3615_p5 = scmp.lt.u32.totalorder %s3606_s16, %s4281_s3 }
 0x19d   : > { %p3609_p13 = pnand %p3608_p8, %p3607_p12 }
 0x19e   : > { %p3614_p2 = por %p3613_p3, %p3612_p1 }
 0x19f   : > { %p3610_p0 = pneg %p3609_p13 }
 0x1a0   : > { %p3616_p7 = por %p3615_p5, %p3614_p2 }
 0x1a2   : > { %p3617_p9 = pnand %p3616_p7, %p3610_p0 }
 0x1a4   : > { %3620 = shalt.err (!%p3617_p9)
}
 0x1a5   : > { %s3621_s20 = scalar_lea.vmem %s4283_s23, 256  ;;  %s3788_s9 = smov [#allocation2]  }
 0x1a6   : > { %p3622_p12 = scmp.ne.s32.totalorder %s4283_s23, %s3621_s20  ;;  %s3626_s18 = sshll.u32 %s3788_s9, 4  ;;  %s3627_s18 = int_to_ptr.vmem [resolvable:$false] %s3626_s18 }
 0x1a7   : > { %s3628_s26 = scalar_lea.vmem %s3627_s18, 512  ;;  %p3629_p4 = scmp.lt.s32.totalorder %s4283_s23, %s3627_s18 }
 0x1a8   : > { %p3624_p13 = pnand %p3622_p12, %p3608_p8  ;;  %p3630_p1 = scmp.lt.s32.totalorder %s3628_s26, %s3621_s20 }
 0x1aa   : > { %p3625_p10 = pneg %p3624_p13  ;;  %p3631_p3 = por %p3630_p1, %p3629_p4 }
 0x1ac   : > { %p3632_p2 = pnand %p3631_p3, %p3625_p10 }
 0x1ae   : > { %3635 = shalt.err (!%p3632_p2)
}
 0x1af   : > { %2993 = dma.hbm_to_vmem [thread:$0]  (!%p4287_p11), %s4281_s3, 256, %s4283_s23, %s4298_s8, %s4685_s1, %s4685_s1, %s4684_s28  }
 0x1b0   : > { %s617_s16 = sand.u32 1, %s3768_s24   ;;  %s3636_s4 = scalar_lea.hbm %s4294_s30, 256 }
 0x1b1   : > { %s4333_s25 = scalar_lea.sflag [#allocation6], %s617_s16  ;;  %p3637_p4 = scmp.ne.s32.totalorder %s4294_s30, %s3636_s4 }
 0x1b2   : > { %s3641_s20 = scalar_lea.hbm %s4699_s6, 512  ;;  %p3642_p5 = scmp.lt.u32.totalorder %s4294_s30, %s4699_s6 }
 0x1b3   : > { %p3639_p10 = pnand %p3637_p4, %p3608_p8  ;;  %p3643_p7 = scmp.lt.u32.totalorder %s3641_s20, %s3636_s4 }
 0x1b4   : > { %p3645_p12 = scmp.lt.u32.totalorder %s3636_s4, %s4294_s30 }
 0x1b5   : > { %p3640_p0 = pneg %p3639_p10  ;;  %p3644_p9 = por %p3643_p7, %p3642_p5 }
 0x1b7   : > { %p3646_p13 = por %p3645_p12, %p3644_p9 }
 0x1b9   : > { %p3647_p1 = pnand %p3646_p13, %p3640_p0 }
 0x1bb   : > { %3650 = shalt.err (!%p3647_p1)
}
 0x1bc   : > { %s3651_s3 = scalar_lea.vmem %s4330_s7, 256  ;;  %s3789_s8 = smov [#allocation5]  }
 0x1bd   : > { %p3652_p3 = scmp.ne.s32.totalorder %s4330_s7, %s3651_s3  ;;  %s3656_s23 = sshll.u32 %s3789_s8, 4  ;;  %s3657_s23 = int_to_ptr.vmem [resolvable:$false] %s3656_s23 }
 0x1be   : > { %s3658_s26 = scalar_lea.vmem %s3657_s23, 512  ;;  %p3659_p10 = scmp.lt.s32.totalorder %s4330_s7, %s3657_s23 }
 0x1bf   : > { %p3654_p2 = pnand %p3652_p3, %p3608_p8  ;;  %p3660_p5 = scmp.lt.s32.totalorder %s3658_s26, %s3651_s3 }
 0x1c1   : > { %p3655_p4 = pneg %p3654_p2  ;;  %p3661_p7 = por %p3660_p5, %p3659_p10 }
 0x1c3   : > { %p3662_p9 = pnand %p3661_p7, %p3655_p4 }
 0x1c5   : > { %3665 = shalt.err (!%p3662_p9)
}
 0x1c6   : > { %2996 = dma.hbm_to_vmem [thread:$0]  (!%p4287_p11), %s4294_s30, 256, %s4330_s7, %s4333_s25, %s4685_s1, %s4685_s1, %s4684_s28  }
 0x1c7   : > { %s4700_s16 = sld [smem:[#allocation44_spill]] }
 0x1cd   : > { %p4701_p8 = scmp.ne.s32.totalorder %s4700_s16, 0 }
 0x1ce   : > { %s4702_s4 = sld [smem:[#allocation41_spill]] (!%p4701_p8) }
 0x1cf   : > { %640 = sbr.rel (%p4701_p8) target bundleno = 4398 (0x112e), region = 84 }
 0x1d4   : > { %s4365_s5 = sand.u32 (!%p4701_p8), 1, %s4702_s4  }
 0x1d5   : > { %s4368_s29 = sshll.u32 (!%p4701_p8), %s4365_s5, 4  ;;  %s643_s0 = scalar_lea.sflag (!%p4701_p8), [#allocation3], %s4365_s5 }
 0x1d6   : > { %s646_s20 = scalar_lea.vmem [#allocation2], %s4368_s29 }
 0x1d7   : > { %3711 = dma.done.wait (%p4262_p6), %s643_s0, 256  }
 0x1d8   : > { %3713 = vsyncadd (%p4262_p6), %s643_s0, 4294967040  ;;  %s4703_s7 = sld [smem:[#allocation43_spill]]  ;;  %s655_s30 = scalar_lea.vmem [#allocation5], %s4368_s29 }
 0x1de   : > { %s651_s28 = sand.u32 1, %s4703_s7  }
 0x1df   : > { %s652_s1 = scalar_lea.sflag [#allocation6], %s651_s28 }
 0x1e0   : > { %3715 = dma.done.wait (%p4262_p6), %s652_s1, 256  }
 0x1e1   : > { %3717 = vsyncadd (%p4262_p6), %s652_s1, 4294967040  ;;  %p4704_p11 = scmp.eq.s32.totalorder %s4703_s7, 0 }
 0x1e3   : > { %3719 = dma.done.wait (%p4704_p11), [#allocation6], 2048   ;;  %p4705_p0 = pmov %p4704_p11 }
 0x1e5   : > { %3721 = vsyncadd (%p4705_p0), [#allocation6], 4294965248  ;;  %p4706_p12 = pmov %p4705_p0 }
 0x1e6   : > { %p4707_p13 = pmov %p4705_p0 }
 0x1e7   : > { %3723 = dma.done.wait (%p4706_p12), [#allocation9], 1056  }
 0x1e8   : > { %3725 = vsyncadd (%p4707_p13), [#allocation9], 4294966240  ;;  %p4708_p1 = pmov %p4705_p0 }
 0x1e9   : > { %p4709_p3 = pmov %p4705_p0 }
 0x1ea   : > { %3727 = dma.done.wait (%p4708_p1), [#allocation12], 1040  }
 0x1eb   : > { %3729 = vsyncadd (%p4709_p3), [#allocation12], 4294966256  ;;  %p4710_p6 = pmov %p4705_p0 }
 0x1ec   : > { %p4711_p2 = pmov %p4705_p0 }
 0x1ed   : > { %3731 = dma.done.wait (%p4710_p6), [#allocation15], 2064  }
 0x1ee   : > { %3733 = vsyncadd (%p4711_p2), [#allocation15], 4294965232  ;;  %p4712_p4 = pmov %p4705_p0 }
 0x1ef   : > { %p4713_p10 = pmov %p4705_p0 }
 0x1f0   : > { %3735 = dma.done.wait (%p4712_p4), [#allocation18], 2080  }
 0x1f1   : > { %3737 = vsyncadd (%p4713_p10), [#allocation18], 4294965216  ;;  %p4714_p5 = pmov %p4705_p0 }
 0x1f2   : > { %p4715_p7 = pmov %p4705_p0 }
 0x1f3   : > { %3739 = dma.done.wait (%p4714_p5), [#allocation21], 32  }
 0x1f4   : > { %3741 = vsyncadd (%p4715_p7), [#allocation21], 4294967264  ;;  %p4716_p9 = pmov %p4705_p0 }
 0x1f5   : > { %p4717_p8 = pmov %p4705_p0 }
 0x1f6   : > { %3743 = dma.done.wait (%p4716_p9), [#allocation24], 32  }
 0x1f7   : > { %3745 = vsyncadd (%p4717_p8), [#allocation24], 4294967264  ;;  %p4718_p11 = pmov %p4705_p0 }
 0x1f9   : > { %3747 = dma.done.wait (%p4718_p11), [#allocation27], 16  }
 0x1fa   : > { %3749 = vsyncadd (%p4705_p0), [#allocation27], 4294967280  ;;  %v3790_v0 = vmov 0   ;;  %v3094_v1 = vld [vmem:[#allocation7 + $0x4] ss:$8 sps:$4 sm:$0xff]   ;;  %v792_v24 = vlaneseq  ;;  %s3791_s17 = smov 96  }
 0x1fb   : > { %914 = vmatprep.mubr.bf16.mxu0 %v3790_v0  ;;  %v3096_v2 = vld [vmem:[#allocation7] ss:$8 sps:$4 sm:$0xff]   ;;  %882 = vmatprep.subr.bf16.mxu0 %v3094_v1  ;;  %v3097_v3 = vld [vmem:[#allocation7 + $0x14] ss:$8 sps:$4 sm:$0xff]   ;;  %v3099_v4 = vld [vmem:[#allocation7 + $0x10] ss:$8 sps:$4 sm:$0xff]  }
 0x1fc   : > { %883 = vmatpush1.bf16.msra.mxu0 %v3096_v2  ;;  %v3100_v5 = vld [vmem:[#allocation7 + $0x24] ss:$8 sps:$4 sm:$0xff]   ;;  %v3102_v6 = vld [vmem:[#allocation7 + $0x20] ss:$8 sps:$4 sm:$0xff]   ;;  %v3103_v7 = vld [vmem:[#allocation7 + $0x34] ss:$8 sps:$4 sm:$0xff]  }
 0x1fd   : > { %884 = vmatprep.subr.bf16.mxu0 %v3097_v3  ;;  %v3105_v8 = vld [vmem:[#allocation7 + $0x30] ss:$8 sps:$4 sm:$0xff]   ;;  %v3106_v9 = vld [vmem:[#allocation7 + $0x44] ss:$8 sps:$4 sm:$0xff]   ;;  %v3108_v10 = vld [vmem:[#allocation7 + $0x40] ss:$8 sps:$4 sm:$0xff]  }
 0x1fe   : > { %v3109_v11 = vld [vmem:[#allocation7 + $0x54] ss:$8 sps:$4 sm:$0xff]   ;;  %v3111_v12 = vld [vmem:[#allocation7 + $0x50] ss:$8 sps:$4 sm:$0xff]   ;;  %v3112_v13 = vld [vmem:[#allocation7 + $0x64] ss:$8 sps:$4 sm:$0xff]  }
 0x1ff   : > { %v3114_v14 = vld [vmem:[#allocation7 + $0x60] ss:$8 sps:$4 sm:$0xff]   ;;  %v3115_v19 = vld [vmem:[#allocation7 + $0x74] ss:$8 sps:$4 sm:$0xff]   ;;  %v3117_v20 = vld [vmem:[#allocation7 + $0x70] ss:$8 sps:$4 sm:$0xff]  }
 0x200   : > { %885 = vmatpush1.bf16.msra.mxu0 %v3099_v4  ;;  %v4417_v15 = vld [vmem:[%s646_s20] sm:$0xff]  ;;  %v4421_v16 = vld [vmem:[%s646_s20 + $0x8] sm:$0xff]  ;;  %v4429_v25 = vshrl.u32 %v792_v24, 7  ;;  %v3792_v40 = vmov 0.0   ;;  %vm3793_vm0 = vmmov 0   ;;  %vm1072_vm1 = vcmask 261120  }
 0x201   : > { %886 = vmatprep.subr.bf16.mxu0 %v3100_v5  ;;  %v768_v17 = vld [vmem:[%s655_s30] sm:$0xff]  ;;  %v769_v18 = vld [vmem:[%s655_s30 + $0x8] sm:$0xff]  ;;  %2777 = vmatprep.subr.bf16.mxu1 %v3792_v40  ;;  %v773_v1 = vpack.c.bf16 %v4421_v16, %v4417_v15  ;;  %vm1117_vm2 = vcmask 130048   ;;  %s3794_s25 = smov 64   ;;  %s3795_s9 = smov 32  }
 0x202   : > { %v770_v21 = vadd.f32 %v768_v17, %v4417_v15  ;;  %v771_v22 = vadd.f32 %v769_v18, %v4421_v16  ;;  %v798_v26 = vsub.s32 1, %v4429_v25  ;;  %v790_v27 = vld [vmem:[#allocation8] sm:$0x3]  ;;  %v794_v28 = vsub.s32 0, %v4429_v25  ;;  %2793 = vmatprep.mubr.msk.bf16.mxu1 %vm3793_vm0, %v3792_v40  ;;  %v3118_v56 = vld [vmem:[#allocation10] sm:$0xff]   ;;  %v3119_v57 = vld [vmem:[#allocation10 + $0x8] sm:$0xff]  }
 0x203   : > { %2778 = vmatpush3.bf16.msra.mxu1 %v3118_v56  ;;  %v3120_v58 = vld [vmem:[#allocation10 + $0x10] sm:$0xff]   ;;  %v3121_v59 = vld [vmem:[#allocation10 + $0x18] sm:$0xff]   ;;  %v3122_v60 = vld [vmem:[#allocation10 + $0x20] sm:$0xff]   ;;  %s2713_s18 = sshll.u32 %s4703_s7, 8  ;;  %s764_s3 = scalar_lea.vmem [#allocation28], %s4368_s29 }
 0x204   : > { %887 = vmatpush1.bf16.msra.mxu0 %v3102_v6  ;;  %v772_v23 = vpack.c.bf16 %v771_v22, %v770_v21  ;;  %v799_v29 = vrot.slane %v790_v27, %v798_v26  ;;  %v795_v30 = vrot.slane %v790_v27, %v794_v28  ;;  %2779 = vmatprep.subr.bf16.mxu1 %v3792_v40  ;;  %v3123_v61 = vld [vmem:[#allocation10 + $0x28] sm:$0xff]   ;;  %v3124_v62 = vld [vmem:[#allocation10 + $0x30] sm:$0xff]   ;;  %v3125_v63 = vld [vmem:[#allocation10 + $0x38] sm:$0xff]   ;;  %s2353_s8 = sshll.u32 %s764_s3, 4  ;;  %s4719_s16 = sld [smem:[#allocation55_spill]]  ;;  %s4578_s8 = int_to_ptr.vmem [resolvable:$true] %s2353_s8 }
 0x205   : > { %888 = vmatprep.subr.bf16.mxu0 %v3103_v7  ;;  %s2340_s0 = scalar_lea.sflag [#allocation4], %s4365_s5  ;;  %s3666_s20 = scalar_lea.vmem %s4578_s8, 256 }
 0x206   : > { %p3667_p12 = scmp.ne.s32.totalorder %s4578_s8, %s3666_s20  ;;  %p4720_p13 = scmp.ne.s32.totalorder %s4695_s2, 0 }
 0x207   : > { %2780 = vmatpush3.bf16.msra.mxu1 %v3119_v57  ;;  %s3796_s29 = smov [#allocation28]  }
 0x208   : > { %889 = vmatpush1.bf16.msra.mxu0 %v3105_v8  ;;  %2781 = vmatprep.subr.bf16.mxu1 %v3792_v40  ;;  %p3668_p1 = pnand %p3667_p12, %p4720_p13  ;;  %s3670_s7 = sshll.u32 %s3796_s29, 4  ;;  %s3671_s7 = int_to_ptr.vmem [resolvable:$false] %s3670_s7 }
 0x209   : > { %890 = vmatprep.subr.bf16.mxu0 %v3106_v9  ;;  %s3672_s28 = scalar_lea.vmem %s3671_s7, 512  ;;  %p3673_p6 = scmp.lt.s32.totalorder %s4578_s8, %s3671_s7 }
 0x20a   : > { %s4576_s4 = scalar_lea.hbm %s4719_s16, %s2713_s18  ;;  %p3669_p3 = pneg %p3668_p1 }
 0x20b   : > { %2782 = vmatpush3.bf16.msra.mxu1 %v3120_v58  ;;  %p3674_p2 = scmp.lt.s32.totalorder %s3672_s28, %s3666_s20 }
 0x20c   : > { %891 = vmatpush1.bf16.msra.mxu0 %v3108_v10  ;;  %2783 = vmatprep.subr.bf16.mxu1 %v3792_v40 }
 0x20d   : > { %892 = vmatprep.subr.bf16.mxu0 %v3109_v11  ;;  %p3675_p4 = por %p3674_p2, %p3673_p6 }
 0x20f   : > { %2784 = vmatpush3.bf16.msra.mxu1 %v3121_v59  ;;  %p3676_p10 = pnand %p3675_p4, %p3669_p3 }
 0x210   : > { %893 = vmatpush1.bf16.msra.mxu0 %v3111_v12  ;;  %2785 = vmatprep.subr.bf16.mxu1 %v3792_v40 }
 0x211   : > { %894 = vmatprep.subr.bf16.mxu0 %v3112_v13 }
 0x213   : > { %2786 = vmatpush3.bf16.msra.mxu1 %v3122_v60 }
 0x214   : > { %895 = vmatpush1.bf16.msra.mxu0 %v3114_v14  ;;  %2787 = vmatprep.subr.bf16.mxu1 %v3792_v40  ;;  %v2639_v14 = vld [vmem:[#allocation11] ss:$0 sm:$0xff] }
 0x215   : > { %896 = vmatprep.subr.bf16.mxu0 %v3115_v19 }
 0x217   : > { %2788 = vmatpush3.bf16.msra.mxu1 %v3123_v61 }
 0x218   : > { %897 = vmatpush1.bf16.msra.mxu0 %v3117_v20  ;;  %2789 = vmatprep.subr.bf16.mxu1 %v3792_v40 }
 0x219   : > { %2797 = vmatprep.subr.bf16.mxu0 %v3792_v40 }
 0x21b   : > { %915 = vmatmul.mubr.bf16.vlgmr.msra.gmra.mrb[0].mxu0 %v772_v23  ;;  %2790 = vmatpush3.bf16.msra.mxu1 %v3124_v62 }
 0x21c   : > { %2801 = vmatprep.mubr.msk.bf16.mxu0 %vm3793_vm0, %v3792_v40  ;;  %2791 = vmatprep.subr.bf16.mxu1 %v3792_v40 }
 0x21f   : > { %2792 = vmatpush3.bf16.msra.mxu1 %v3125_v63 }
 0x220   : > { %2805 = vmatprep.subr.bf16.mxu1 %v3792_v40 }
 0x222   : > { %2794 = vmatmul.mubr.bf16.vlgmr.msra.gmra.mrb[0].mxu1 %v773_v1 }
 0x223   : > { %2807 = vmatprep.mubr.msk.bf16.mxu1 %vm3793_vm0, %v3792_v40 }
 0x2ee   : > { %v916_v31 = vpop.f32.mrb[0].mxu0 }
 0x2ef   : > { %v918_v32 = vpop.f32.mrb[1].mxu0  ;;  %v917_v35 = vadd.f32 %v916_v31, %v795_v30 }
 0x2f0   : > { %v4437_v33 = vadd.f32 %v918_v32, %v799_v29  ;;  %v920_v34 = vpop.f32.mrb[2].mxu0 }
 0x2f1   : > { %v921_v36 = vadd.f32 %v920_v34, %v795_v30  ;;  %v922_v37 = vpop.f32.mrb[3].mxu0 }
 0x2f2   : > { %1193 = vrot.lane.b32.xlu0 %v4437_v33, %s3791_s17  ;;  %v4443_v39 = vadd.f32 %v922_v37, %v799_v29 }
 0x2f3   : > { %v4441_v38 = vpack.c.bf16 %v921_v36, %v917_v35 }
 0x2f5   : > { %1234 = vrot.lane.b32.xlu1 %v4441_v38, %s3791_s17  ;;  %v1030_v17 = vpop.f32.mrb[0].mxu1 }
 0x2f6   : > { %1195 = vrot.lane.b32.xlu0 %v4443_v39, %s3791_s17  ;;  %v1031_v18 = vadd.f32 %v2639_v14, %v1030_v17  ;;  %v2795_v19 = vpop.f32.mrb[1].mxu1 }
 0x2f7   : > { %v1033_v20 = vpop.f32.mrb[2].mxu1 }
 0x2f8   : > { %v1034_v21 = vadd.f32 %v2639_v14, %v1033_v20  ;;  %v2796_v22 = vpop.f32.mrb[3].mxu1 }
 0x2fa   : > { %v4484_v23 = vpack.c.bf16 %v1034_v21, %v1031_v18 }
 0x2fc   : > { %2806 = vmatpush3.bf16.msra.mxu1 %v4484_v23 }
 0x2fd   : > { %2819 = vmatprep.subr.bf16.mxu1 %v3792_v40 }
 0x31e   : > { %1038 = vxpose.xlu1.b32.start [1/2] (short) (narrow) %v4437_v33, 32 }
 0x322   : > { %1039 = vxpose.xlu1.b32.end [2/2] (short) (narrow) %v4443_v39, 32 }
 0x364   : > { %v1194_v41 = vpop.permute.xlu0 %1193 }
 0x365   : > { %1199 = vxpose.xlu0.b32.start [1/2] (short) (narrow) %v1194_v41, 32 }
 0x367   : > { %v1235_v43 = vpop.permute.xlu1 %1234 }
 0x368   : > { %v1196_v42 = vpop.permute.xlu0 %1195 }
 0x369   : > { %1200 = vxpose.xlu0.b32.end [2/2] (short) (narrow) %v1196_v42, 32 }
 0x39e   : > { %v1054_v44 = vpop.trf.xlu1 }
 0x3a2   : > { %v1055_v45 = vpop.trf.xlu1 }
 0x3a3   : > { %v1070_v46 = vpack.c.bf16 %v1055_v45, %v1054_v44 }
 0x3a5   : > { %2798 = vmatpush3.bf16.msra.mxu0 %v1070_v46 }
 0x3a6   : > { %v1056_v47 = vpop.trf.xlu1  ;;  %2799 = vmatprep.subr.bf16.mxu0 %v3792_v40 }
 0x3aa   : > { %v1057_v48 = vpop.trf.xlu1 }
 0x3ab   : > { %v1071_v49 = vpack.c.bf16 %v1057_v48, %v1056_v47 }
 0x3ad   : > { %2800 = vmatpush3.bf16.msra.mxu0 %v1071_v49 }
 0x3ae   : > { %2811 = vmatprep.subr.bf16.mxu0 %v3792_v40 }
 0x3b0   : > { %2802 = vmatmul.mubr.msk.bf16.vlgmr.msra.gmra.mrb[4].mxu0 %vm1072_vm1, %v4441_v38 }
 0x3b1   : > { %2815 = vmatprep.mubr.msk.bf16.mxu0 %vm3793_vm0, %v3792_v40 }
 0x3e5   : > { %v1215_v50 = vpop.trf.xlu0 }
 0x3e9   : > { %v1216_v51 = vpop.trf.xlu0 }
 0x3ea   : > { %v1231_v52 = vpack.c.bf16 %v1216_v51, %v1215_v50 }
 0x3ec   : > { %2812 = vmatpush3.bf16.msra.mxu0 %v1231_v52 }
 0x3ed   : > { %v1217_v53 = vpop.trf.xlu0  ;;  %2813 = vmatprep.subr.bf16.mxu0 %v3792_v40 }
 0x3f1   : > { %v1218_v54 = vpop.trf.xlu0 }
 0x3f2   : > { %v1232_v55 = vpack.c.bf16 %v1218_v54, %v1217_v53 }
 0x3f4   : > { %2814 = vmatpush3.bf16.msra.mxu0 %v1232_v55 }
 0x3f5   : > { %2825 = vmatprep.subr.bf16.mxu0 %v3792_v40 }
 0x3f7   : > { %2816 = vmatmul.mubr.msk.bf16.vlgmr.msra.gmra.mrb[8].mxu0 %vm1072_vm1, %v1235_v43 }
 0x3f8   : > { %2829 = vmatprep.mubr.msk.bf16.mxu0 %vm3793_vm0, %v3792_v40 }
 0x483   : > { %v1110_v2 = vpop.f32.mrb[4].mxu0 }
 0x484   : > { %v2803_v3 = vpop.f32.mrb[5].mxu0  ;;  %v1118_v4 = vsel %vm1117_vm2, %v1110_v2, -inf }
 0x485   : > { %1119 = vmax.xlane.f32.xlu0 %v1118_v4  ;;  %v1113_v5 = vpop.f32.mrb[6].mxu0  ;;  %v3126_v4 = vld [vmem:[#allocation13] sm:$0xff]  }
 0x486   : > { %v2804_v6 = vpop.f32.mrb[7].mxu0  ;;  %v1121_v7 = vsel %vm1117_vm2, %v1113_v5, -inf }
 0x487   : > { %1122 = vmax.xlane.f32.xlu1 %v1121_v7  ;;  %v3127_v6 = vld [vmem:[#allocation13 + $0x8] sm:$0xff]   ;;  %v3128_v7 = vld [vmem:[#allocation13 + $0x10] sm:$0xff]  }
 0x488   : > { %2826 = vmatpush3.bf16.msra.mxu0 %v3128_v7 }
 0x489   : > { %2827 = vmatprep.subr.bf16.mxu0 %v3792_v40 }
 0x4ca   : > { %v1273_v8 = vpop.f32.mrb[8].mxu0 }
 0x4cb   : > { %v2817_v9 = vpop.f32.mrb[9].mxu0  ;;  %v1280_v10 = vsel %vm1117_vm2, %v1273_v8, -inf }
 0x4cc   : > { %1281 = vmax.xlane.f32.xlu0 %v1280_v10  ;;  %v1276_v11 = vpop.f32.mrb[10].mxu0 }
 0x4cd   : > { %v2818_v12 = vpop.f32.mrb[11].mxu0  ;;  %v1283_v13 = vsel %vm1117_vm2, %v1276_v11, -inf }
 0x4ce   : > { %1284 = vmax.xlane.f32.xlu1 %v1283_v13 }
 0x512   : > { %v1120_v24 = vpop.xlane.xlu0 %1119 }
 0x513   : > { %v1124_v27 = vsub.f32 %v1110_v2, %v1120_v24 }
 0x514   : > { %v1123_v29 = vpop.xlane.xlu1 %1122 }
 0x515   : > { %v1126_v30 = vmul.f32 1.442695, %v1124_v27  ;;  %v1125_v31 = vsub.f32 %v1113_v5, %v1123_v29 }
 0x517   : > { %3174 = vpow2.f32 %v1126_v30  ;;  %v1128_v32 = vmul.f32 1.442695, %v1125_v31 }
 0x519   : > { %3176 = vpow2.f32 %v1128_v32 }
 0x521   : > { %v3175_v34 = vpop.eup %3174 }
 0x522   : > { %v1130_v35 = vsel %vm1117_vm2, %v3175_v34, 0.0 }
 0x523   : > { %v3177_v36 = vpop.eup %3176  ;;  %1131 = vadd.xlane.f32.xlu0 %v1130_v35 }
 0x524   : > { %v1133_v37 = vsel %vm1117_vm2, %v3177_v36, 0.0 }
 0x525   : > { %1134 = vadd.xlane.f32.xlu1 %v1133_v37 }
 0x559   : > { %v1282_v41 = vpop.xlane.xlu0 %1281 }
 0x55a   : > { %v1286_v42 = vsub.f32 %v1273_v8, %v1282_v41  ;;  %v3129_v8 = vld [vmem:[#allocation13 + $0x18] sm:$0xff]  }
 0x55b   : > { %v1285_v43 = vpop.xlane.xlu1 %1284  ;;  %2828 = vmatpush3.bf16.msra.mxu0 %v3129_v8 }
 0x55c   : > { %v1288_v44 = vmul.f32 1.442695, %v1286_v42  ;;  %v1287_v45 = vsub.f32 %v1276_v11, %v1285_v43  ;;  %2841 = vmatprep.subr.bf16.mxu0 %v3792_v40 }
 0x55e   : > { %3178 = vpow2.f32 %v1288_v44  ;;  %v1290_v46 = vmul.f32 1.442695, %v1287_v45 }
 0x560   : > { %3180 = vpow2.f32 %v1290_v46 }
 0x568   : > { %v3179_v47 = vpop.eup %3178 }
 0x569   : > { %v1292_v48 = vsel %vm1117_vm2, %v3179_v47, 0.0 }
 0x56a   : > { %v3181_v49 = vpop.eup %3180  ;;  %1293 = vadd.xlane.f32.xlu0 %v1292_v48 }
 0x56b   : > { %v1295_v50 = vsel %vm1117_vm2, %v3181_v49, 0.0 }
 0x56c   : > { %1296 = vadd.xlane.f32.xlu1 %v1295_v50 }
 0x57d   : > { %1469 = vrot.lane.b32.xlu1 %v4437_v33, %s3794_s25 }
 0x580   : > { %1304 = vrot.lane.b32.xlu0 %v4484_v23, %s3791_s17 }
 0x581   : > { %1471 = vrot.lane.b32.xlu1 %v4443_v39, %s3794_s25 }
 0x584   : > { %1509 = vrot.lane.b32.xlu0 %v4441_v38, %s3794_s25 }
 0x5b0   : > { %v1132_v51 = vpop.xlane.xlu0 %1131 }
 0x5b1   : > { %3182 = vrcp.f32 %v1132_v51 }
 0x5b2   : > { %v1135_v52 = vpop.xlane.xlu1 %1134 }
 0x5b3   : > { %3184 = vrcp.f32 %v1135_v52  ;;  %v3089_v52 = vpack.i.bf16 %v4443_v39, %v4437_v33 }
 0x5bb   : > { %v3183_v53 = vpop.eup %3182 }
 0x5bc   : > { %v1138_v55 = vmul.f32 %v3183_v53, %v3175_v34 }
 0x5bd   : > { %v3185_v54 = vpop.eup %3184 }
 0x5be   : > { %v1139_v56 = vmul.f32 %v3185_v54, %v3177_v36 }
 0x5c0   : > { %v1141_v57 = vpack.c.bf16 %v1139_v56, %v1138_v55 }
 0x5c2   : > { %2808 = vmatmul.mubr.msk.bf16.vlgmr.msra.gmra.mrb[4].mxu1 %vm1117_vm2, %v1141_v57 }
 0x5c3   : > { %2821 = vmatprep.mubr.msk.bf16.mxu1 %vm3793_vm0, %v3792_v40 }
 0x5f7   : > { %v1294_v58 = vpop.xlane.xlu0 %1293 }
 0x5f8   : > { %3186 = vrcp.f32 %v1294_v58 }
 0x5f9   : > { %v1297_v59 = vpop.xlane.xlu1 %1296 }
 0x5fa   : > { %3188 = vrcp.f32 %v1297_v59 }
 0x5fb   : > { %v1305_v60 = vpop.permute.xlu0 %1304 }
 0x5fc   : > { %2820 = vmatpush3.bf16.msra.mxu1 %v1305_v60 }
 0x5fd   : > { %v1470_v61 = vpop.permute.xlu1 %1469  ;;  %2833 = vmatprep.subr.bf16.mxu1 %v3792_v40 }
 0x5fe   : > { %1475 = vxpose.xlu1.b32.start [1/2] (short) (narrow) %v1470_v61, 32 }
 0x5ff   : > { %v1510_v31 = vpop.permute.xlu0 %1509 }
 0x601   : > { %v1472_v62 = vpop.permute.xlu1 %1471 }
 0x602   : > { %v3187_v63 = vpop.eup %3186  ;;  %1476 = vxpose.xlu1.b32.end [2/2] (short) (narrow) %v1472_v62, 32 }
 0x603   : > { %v1300_v2 = vmul.f32 %v3187_v63, %v3179_v47 }
 0x604   : > { %v3189_v1 = vpop.eup %3188 }
 0x605   : > { %v1301_v3 = vmul.f32 %v3189_v1, %v3181_v49  ;;  %v3130_v1 = vld [vmem:[#allocation13 + $0x20] sm:$0xff]  }
 0x607   : > { %v1302_v5 = vpack.c.bf16 %v1301_v3, %v1300_v2 }
 0x609   : > { %2822 = vmatmul.mubr.msk.bf16.vlgmr.msra.gmra.mrb[8].mxu1 %vm1117_vm2, %v1302_v5 }
 0x60a   : > { %2834 = vmatpush3.bf16.msra.mxu1 %v3126_v4  ;;  %2837 = vmatprep.mubr.msk.bf16.mxu1 %vm3793_vm0, %v3792_v40 }
 0x60b   : > { %2835 = vmatprep.subr.bf16.mxu1 %v3792_v40 }
 0x60e   : > { %2836 = vmatpush3.bf16.msra.mxu1 %v3127_v6 }
 0x60f   : > { %2849 = vmatprep.subr.bf16.mxu1 %v3792_v40 }
 0x67e   : > { %v1491_v14 = vpop.trf.xlu1 }
 0x682   : > { %v1492_v17 = vpop.trf.xlu1 }
 0x683   : > { %v1507_v27 = vpack.c.bf16 %v1492_v17, %v1491_v14  ;;  %v3131_v17 = vld [vmem:[#allocation13 + $0x28] sm:$0xff]  }
 0x686   : > { %v1493_v18 = vpop.trf.xlu1 }
 0x68a   : > { %v1494_v29 = vpop.trf.xlu1 }
 0x68b   : > { %v1508_v30 = vpack.c.bf16 %v1494_v29, %v1493_v18 }
 0x695   : > { %v1179_v9 = vpop.f32.mrb[4].mxu1 }
 0x696   : > { %v2809_v10 = vpop.f32.mrb[5].mxu1 }
 0x697   : > { %v1182_v11 = vpop.f32.mrb[6].mxu1 }
 0x698   : > { %v1186_v12 = vpack.c.bf16 %v1182_v11, %v1179_v9  ;;  %v2810_v13 = vpop.f32.mrb[7].mxu1 }
 0x69a   : > { %2838 = vmatmul.mubr.msk.bf16.vlgmr.msra.gmra.mrb[12].mxu1 %vm1072_vm1, %v1186_v12 }
 0x69b   : > { %2851 = vmatprep.mubr.msk.bf16.mxu1 %vm3793_vm0, %v3792_v40 }
 0x6dc   : > { %v1344_v19 = vpop.f32.mrb[8].mxu1 }
 0x6dd   : > { %v2823_v20 = vpop.f32.mrb[9].mxu1 }
 0x6de   : > { %v1347_v21 = vpop.f32.mrb[10].mxu1 }
 0x6df   : > { %v1351_v22 = vpack.c.bf16 %v1347_v21, %v1344_v19  ;;  %v2824_v24 = vpop.f32.mrb[11].mxu1 }
 0x6e1   : > { %2830 = vmatmul.mubr.msk.bf16.vlgmr.msra.gmra.mrb[12].mxu0 %vm1072_vm1, %v1351_v22 }
 0x6e2   : > { %2842 = vmatpush3.bf16.msra.mxu0 %v1507_v27  ;;  %2845 = vmatprep.mubr.msk.bf16.mxu0 %vm3793_vm0, %v3792_v40 }
 0x6e3   : > { %2843 = vmatprep.subr.bf16.mxu0 %v3792_v40 }
 0x6e6   : > { %2844 = vmatpush3.bf16.msra.mxu0 %v1508_v30 }
 0x6e7   : > { %2855 = vmatprep.subr.bf16.mxu0 %v3792_v40 }
 0x6e9   : > { %2846 = vmatmul.mubr.msk.bf16.vlgmr.msra.gmra.mrb[16].mxu0 %vm1072_vm1, %v1510_v31 }
 0x6ea   : > { %2859 = vmatprep.mubr.msk.bf16.mxu0 %vm3793_vm0, %v3792_v40  ;;  %2856 = vmatpush3.bf16.msra.mxu0 %v3130_v1 }
 0x6eb   : > { %2857 = vmatprep.subr.bf16.mxu0 %v3792_v40 }
 0x6ee   : > { %2858 = vmatpush3.bf16.msra.mxu0 %v3131_v17 }
 0x6ef   : > { %2871 = vmatprep.subr.bf16.mxu0 %v3792_v40 }
 0x76d   : > { %v1462_v32 = vpop.f32.mrb[12].mxu1 }
 0x76e   : > { %v2839_v34 = vpop.f32.mrb[13].mxu1 }
 0x76f   : > { %v1465_v35 = vpop.f32.mrb[14].mxu1 }
 0x770   : > { %v2840_v36 = vpop.f32.mrb[15].mxu1 }
 0x7b4   : > { %v1406_v37 = vpop.f32.mrb[12].mxu0 }
 0x7b5   : > { %v4522_v41 = vadd.f32 %v1462_v32, %v1406_v37  ;;  %v2831_v42 = vpop.f32.mrb[13].mxu0 }
 0x7b6   : > { %v1409_v43 = vpop.f32.mrb[14].mxu0 }
 0x7b7   : > { %v4524_v44 = vadd.f32 %v1465_v35, %v1409_v43  ;;  %v2832_v45 = vpop.f32.mrb[15].mxu0 }
 0x7bc   : > { %v1548_v46 = vpop.f32.mrb[16].mxu0 }
 0x7bd   : > { %v2847_v47 = vpop.f32.mrb[17].mxu0  ;;  %v1555_v48 = vsel %vm1117_vm2, %v1548_v46, -inf }
 0x7be   : > { %1556 = vmax.xlane.f32.xlu0 %v1555_v48  ;;  %v1551_v49 = vpop.f32.mrb[18].mxu0 }
 0x7bf   : > { %v2848_v50 = vpop.f32.mrb[19].mxu0  ;;  %v1558_v51 = vsel %vm1117_vm2, %v1551_v49, -inf }
 0x7c2   : > { %1559 = vmax.xlane.f32.xlu0 %v1558_v51 }
 0x7d8   : > { %3090 = vrot.lane.b32.xlu0 %v3089_v52, %s3795_s9 }
 0x84b   : > { %v1557_v53 = vpop.xlane.xlu0 %1556 }
 0x84c   : > { %v1561_v54 = vsub.f32 %v1548_v46, %v1557_v53 }
 0x84e   : > { %v1563_v55 = vmul.f32 1.442695, %v1561_v54 }
 0x84f   : > { %v1560_v56 = vpop.xlane.xlu0 %1559 }
 0x850   : > { %3190 = vpow2.f32 %v1563_v55  ;;  %v1562_v57 = vsub.f32 %v1551_v49, %v1560_v56  ;;  %v3132_v56 = vld [vmem:[#allocation13 + $0x30] sm:$0xff]  }
 0x852   : > { %v1565_v58 = vmul.f32 1.442695, %v1562_v57 }
 0x853   : > { %v3091_v33 = vpop.permute.xlu0 %3090 }
 0x854   : > { %3192 = vpow2.f32 %v1565_v58  ;;  %v3092_v39 = vunpack.i.l.bf16 %v3091_v33  ;;  %v3093_v63 = vunpack.i.h.bf16 %v3091_v33 }
 0x85a   : > { %v3191_v59 = vpop.eup %3190 }
 0x85b   : > { %v1567_v60 = vsel %vm1117_vm2, %v3191_v59, 0.0 }
 0x85c   : > { %1568 = vadd.xlane.f32.xlu1 %v1567_v60 }
 0x85e   : > { %v3193_v61 = vpop.eup %3192 }
 0x85f   : > { %v1570_v62 = vsel %vm1117_vm2, %v3193_v61, 0.0 }
 0x860   : > { %1571 = vadd.xlane.f32.xlu0 %v1570_v62 }
 0x86d   : > { %1729 = vrot.lane.b32.xlu1 %v4441_v38, %s3795_s9 }
 0x876   : > { %1578 = vrot.lane.b32.xlu0 %v4484_v23, %s3794_s25 }
 0x896   : > { %1695 = vxpose.xlu1.b32.start [1/2] (short) (narrow) %v3092_v39, 32 }
 0x89a   : > { %1696 = vxpose.xlu1.b32.end [2/2] (short) (narrow) %v3093_v63, 32 }
 0x8c0   : > { %1798 = vrot.lane.b32.xlu1 %v4484_v23, %s3795_s9 }
 0x8e9   : > { %v1569_v2 = vpop.xlane.xlu1 %1568 }
 0x8ea   : > { %3194 = vrcp.f32 %v1569_v2 }
 0x8ed   : > { %v1572_v3 = vpop.xlane.xlu0 %1571  ;;  %v1730_v9 = vpop.permute.xlu1 %1729 }
 0x8ee   : > { %3196 = vrcp.f32 %v1572_v3  ;;  %v2668_v3 = vld [vmem:[#allocation14] ss:$0 sm:$0xff] }
 0x8f1   : > { %v1579_v4 = vpop.permute.xlu0 %1578 }
 0x8f2   : > { %2850 = vmatpush3.bf16.msra.mxu1 %v1579_v4 }
 0x8f3   : > { %2863 = vmatprep.subr.bf16.mxu1 %v3792_v40 }
 0x8f4   : > { %v3195_v38 = vpop.eup %3194 }
 0x8f5   : > { %v1575_v6 = vmul.f32 %v3195_v38, %v3191_v59 }
 0x8f8   : > { %v3197_v5 = vpop.eup %3196 }
 0x8f9   : > { %v1576_v7 = vmul.f32 %v3197_v5, %v3193_v61 }
 0x8fb   : > { %v1577_v8 = vpack.c.bf16 %v1576_v7, %v1575_v6 }
 0x8fd   : > { %2852 = vmatmul.mubr.msk.bf16.vlgmr.msra.gmra.mrb[16].mxu1 %vm1117_vm2, %v1577_v8 }
 0x8fe   : > { %2867 = vmatprep.mubr.msk.bf16.mxu1 %vm3793_vm0, %v3792_v40 }
 0x916   : > { %v1711_v23 = vpop.trf.xlu1 }
 0x91a   : > { %v1712_v10 = vpop.trf.xlu1 }
 0x91b   : > { %v1727_v11 = vpack.c.bf16 %v1712_v10, %v1711_v23  ;;  %v3134_v10 = vld [vmem:[#allocation16] ss:$8 sps:$4 sm:$0xff]  }
 0x91d   : > { %2864 = vmatpush3.bf16.msra.mxu1 %v1727_v11  ;;  %v3136_v11 = vld [vmem:[#allocation16 + $0x4] ss:$8 sps:$4 sm:$0xff]  }
 0x91e   : > { %v1713_v12 = vpop.trf.xlu1  ;;  %2865 = vmatprep.subr.bf16.mxu1 %v3792_v40 }
 0x922   : > { %v1714_v13 = vpop.trf.xlu1 }
 0x923   : > { %v1728_v14 = vpack.c.bf16 %v1714_v13, %v1713_v12  ;;  %v3139_v12 = vld [vmem:[#allocation16 + $0x14] ss:$8 sps:$4 sm:$0xff]   ;;  %v3137_v13 = vld [vmem:[#allocation16 + $0x10] ss:$8 sps:$4 sm:$0xff]  }
 0x925   : > { %2866 = vmatpush3.bf16.msra.mxu1 %v1728_v14 }
 0x926   : > { %2877 = vmatprep.subr.bf16.mxu1 %v3792_v40 }
 0x928   : > { %2868 = vmatmul.mubr.msk.bf16.vlgmr.msra.gmra.mrb[20].mxu1 %vm1072_vm1, %v1730_v9 }
 0x929   : > { %2881 = vmatprep.mubr.msk.bf16.mxu1 %vm3793_vm0, %v3792_v40  ;;  %2878 = vmatpush3.bf16.msra.mxu1 %v3132_v56 }
 0x92a   : > { %2879 = vmatprep.subr.bf16.mxu1 %v3792_v40 }
 0x932   : > { %v1799_v24 = vpop.permute.xlu1 %1798 }
 0x9d0   : > { %v1618_v18 = vpop.f32.mrb[16].mxu1 }
 0x9d1   : > { %v2853_v19 = vpop.f32.mrb[17].mxu1 }
 0x9d2   : > { %v1621_v20 = vpop.f32.mrb[18].mxu1 }
 0x9d3   : > { %v1625_v21 = vpack.c.bf16 %v1621_v20, %v1618_v18  ;;  %v2854_v22 = vpop.f32.mrb[19].mxu1 }
 0x9d4   : > { %v3142_v22 = vld [vmem:[#allocation16 + $0x24] ss:$8 sps:$4 sm:$0xff]  }
 0x9d5   : > { %2860 = vmatmul.mubr.msk.bf16.vlgmr.msra.gmra.mrb[20].mxu0 %vm1072_vm1, %v1625_v21 }
 0x9d6   : > { %2872 = vmatpush3.bf16.msra.mxu0 %v1799_v24  ;;  %2873 = vmatprep.mubr.msk.bf16.mxu0 %vm3793_vm0, %v3792_v40  ;;  %v3140_v24 = vld [vmem:[#allocation16 + $0x20] ss:$8 sps:$4 sm:$0xff]  }
 0x9d7   : > { %2070 = vmatprep.subr.bf16.mxu0 %v3136_v11 }
 0x9fb   : > { %v1768_v27 = vpop.f32.mrb[20].mxu1 }
 0x9fc   : > { %v2869_v29 = vpop.f32.mrb[21].mxu1  ;;  %v1775_v30 = vsel %vm1117_vm2, %v1768_v27, -inf }
 0x9fd   : > { %1776 = vmax.xlane.f32.xlu0 %v1775_v30  ;;  %v1771_v31 = vpop.f32.mrb[22].mxu1  ;;  %v3143_v29 = vld [vmem:[#allocation16 + $0x30] ss:$8 sps:$4 sm:$0xff]   ;;  %v3148_v30 = vld [vmem:[#allocation16 + $0x44] ss:$8 sps:$4 sm:$0xff]  }
 0x9fe   : > { %v2870_v32 = vpop.f32.mrb[23].mxu1  ;;  %v1778_v34 = vsel %vm1117_vm2, %v1771_v31, -inf }
 0x9ff   : > { %v3151_v32 = vld [vmem:[#allocation16 + $0x54] ss:$8 sps:$4 sm:$0xff]  }
 0xa01   : > { %1779 = vmax.xlane.f32.xlu0 %v1778_v34  ;;  %v3149_v34 = vld [vmem:[#allocation16 + $0x50] ss:$8 sps:$4 sm:$0xff]  }
 0xa8a   : > { %v1777_v35 = vpop.xlane.xlu0 %1776 }
 0xa8b   : > { %v1781_v36 = vsub.f32 %v1768_v27, %v1777_v35  ;;  %v3145_v27 = vld [vmem:[#allocation16 + $0x34] ss:$8 sps:$4 sm:$0xff]   ;;  %v3154_v35 = vld [vmem:[#allocation16 + $0x64] ss:$8 sps:$4 sm:$0xff]  }
 0xa8d   : > { %v1783_v37 = vmul.f32 1.442695, %v1781_v36  ;;  %v3152_v36 = vld [vmem:[#allocation16 + $0x60] ss:$8 sps:$4 sm:$0xff]  }
 0xa8e   : > { %v1780_v42 = vpop.xlane.xlu0 %1779 }
 0xa8f   : > { %3198 = vpow2.f32 %v1783_v37  ;;  %v1782_v43 = vsub.f32 %v1771_v31, %v1780_v42  ;;  %v3146_v31 = vld [vmem:[#allocation16 + $0x40] ss:$8 sps:$4 sm:$0xff]   ;;  %v3157_v37 = vld [vmem:[#allocation16 + $0x74] ss:$8 sps:$4 sm:$0xff]   ;;  %v3155_v42 = vld [vmem:[#allocation16 + $0x70] ss:$8 sps:$4 sm:$0xff]  }
 0xa91   : > { %v1785_v45 = vmul.f32 1.442695, %v1782_v43  ;;  %v3158_v43 = vld [vmem:[#allocation19 + $0x40] sm:$0xff]  }
 0xa93   : > { %3200 = vpow2.f32 %v1785_v45  ;;  %v3159_v45 = vld [vmem:[#allocation19] sm:$0xff]  }
 0xa99   : > { %v3199_v46 = vpop.eup %3198 }
 0xa9a   : > { %v1787_v47 = vsel %vm1117_vm2, %v3199_v46, 0.0 }
 0xa9b   : > { %1788 = vadd.xlane.f32.xlu0 %v1787_v47  ;;  %v3161_v47 = vld [vmem:[#allocation19 + $0x8] sm:$0xff]  }
 0xa9d   : > { %v3201_v48 = vpop.eup %3200 }
 0xa9e   : > { %v1790_v49 = vsel %vm1117_vm2, %v3201_v48, 0.0 }
 0xa9f   : > { %1791 = vadd.xlane.f32.xlu0 %v1790_v49  ;;  %v3163_v49 = vld [vmem:[#allocation19 + $0x10] sm:$0xff]  }
 0xaa8   : > { %v1680_v50 = vpop.f32.mrb[20].mxu0 }
 0xaa9   : > { %v1687_v51 = vadd.f32 %v1680_v50, %v4522_v41  ;;  %v2861_v52 = vpop.f32.mrb[21].mxu0  ;;  %v3133_v41 = vld [vmem:[#allocation13 + $0x38] sm:$0xff]  }
 0xaaa   : > { %v1683_v53 = vpop.f32.mrb[22].mxu0  ;;  %2880 = vmatpush3.bf16.msra.mxu1 %v3133_v41  ;;  %v3164_v50 = vld [vmem:[#allocation19 + $0x58] sm:$0xff]   ;;  %v3166_v52 = vld [vmem:[#allocation19 + $0x60] sm:$0xff]  }
 0xaab   : > { %v1688_v54 = vadd.f32 %v1683_v53, %v4524_v44  ;;  %v2862_v55 = vpop.f32.mrb[23].mxu0  ;;  %2755 = vmatprep.subr.bf16.mxu1 %v3158_v43  ;;  %v3167_v53 = vld [vmem:[#allocation19 + $0x20] sm:$0xff]  }
 0xb28   : > { %v1789_v57 = vpop.xlane.xlu0 %1788 }
 0xb29   : > { %3202 = vrcp.f32 %v1789_v57 }
 0xb2c   : > { %v1792_v58 = vpop.xlane.xlu0 %1791 }
 0xb2d   : > { %3204 = vrcp.f32 %v1792_v58 }
 0xb33   : > { %v3203_v59 = vpop.eup %3202 }
 0xb34   : > { %v1795_v61 = vmul.f32 %v3203_v59, %v3199_v46  ;;  %v3160_v46 = vld [vmem:[#allocation19 + $0x48] sm:$0xff]  }
 0xb37   : > { %v3205_v60 = vpop.eup %3204 }
 0xb38   : > { %v1796_v62 = vmul.f32 %v3205_v60, %v3201_v48  ;;  %v3162_v48 = vld [vmem:[#allocation19 + $0x50] sm:$0xff]  }
 0xb3a   : > { %v1797_v33 = vpack.c.bf16 %v1796_v62, %v1795_v61 }
 0xb3c   : > { %2874 = vmatmul.mubr.msk.bf16.vlgmr.msra.gmra.mrb[24].mxu0 %vm1117_vm2, %v1797_v33  ;;  %v2669_v33 = vld [vmem:[#allocation22] ss:$0 sm:$0xff] }
 0xb3d   : > { %2102 = vmatprep.mubr.bf16.mxu0 %v3790_v0  ;;  %2071 = vmatpush1.bf16.msra.mxu0 %v3134_v10 }
 0xb3e   : > { %2072 = vmatprep.subr.bf16.mxu0 %v3139_v12 }
 0xb41   : > { %2073 = vmatpush1.bf16.msra.mxu0 %v3137_v13 }
 0xb42   : > { %2074 = vmatprep.subr.bf16.mxu0 %v3142_v22 }
 0xb45   : > { %2075 = vmatpush1.bf16.msra.mxu0 %v3140_v24  ;;  %v2687_v24 = vld [vmem:[#allocation20] ss:$0 sm:$0xff] }
 0xb46   : > { %2076 = vmatprep.subr.bf16.mxu0 %v3145_v27 }
 0xb49   : > { %2077 = vmatpush1.bf16.msra.mxu0 %v3143_v29 }
 0xb4a   : > { %2078 = vmatprep.subr.bf16.mxu0 %v3148_v30 }
 0xb4d   : > { %2079 = vmatpush1.bf16.msra.mxu0 %v3146_v31 }
 0xb4e   : > { %2080 = vmatprep.subr.bf16.mxu0 %v3151_v32 }
 0xb51   : > { %2081 = vmatpush1.bf16.msra.mxu0 %v3149_v34 }
 0xb52   : > { %2082 = vmatprep.subr.bf16.mxu0 %v3154_v35 }
 0xb55   : > { %2083 = vmatpush1.bf16.msra.mxu0 %v3152_v36 }
 0xb56   : > { %2084 = vmatprep.subr.bf16.mxu0 %v3157_v37 }
 0xb59   : > { %2085 = vmatpush1.bf16.msra.mxu0 %v3155_v42 }
 0xc0f   : > { %v1838_v44 = vpop.f32.mrb[24].mxu0 }
 0xc10   : > { %v2875_v39 = vpop.f32.mrb[25].mxu0 }
 0xc11   : > { %v1841_v63 = vpop.f32.mrb[26].mxu0 }
 0xc12   : > { %v1845_v1 = vpack.c.bf16 %v1841_v63, %v1838_v44  ;;  %v2876_v40 = vpop.f32.mrb[27].mxu0  ;;  %v2670_v63 = vld [vmem:[#allocation23] ss:$0 sm:$0xff] }
 0xc14   : > { %2882 = vmatmul.mubr.msk.bf16.vlgmr.msra.gmra.mrb[24].mxu1 %vm1072_vm1, %v1845_v1 }
 0xc15   : > { %2756 = vmatpush3.bf16.msra.mxu1 %v3159_v45 }
 0xc16   : > { %2757 = vmatprep.subr.bf16.mxu1 %v3160_v46 }
 0xc19   : > { %2758 = vmatpush3.bf16.msra.mxu1 %v3161_v47 }
 0xc1a   : > { %2759 = vmatprep.subr.bf16.mxu1 %v3162_v48 }
 0xc1d   : > { %2760 = vmatpush3.bf16.msra.mxu1 %v3163_v49 }
 0xc1e   : > { %2761 = vmatprep.subr.bf16.mxu1 %v3164_v50 }
 0xce7   : > { %v1900_v2 = vpop.f32.mrb[24].mxu1 }
 0xce8   : > { %v1907_v4 = vadd.f32 %v1900_v2, %v1687_v51  ;;  %v2883_v38 = vpop.f32.mrb[25].mxu1  ;;  %v3165_v51 = vld [vmem:[#allocation19 + $0x18] sm:$0xff]  }
 0xce9   : > { %v1903_v5 = vpop.f32.mrb[26].mxu1  ;;  %2762 = vmatpush3.bf16.msra.mxu1 %v3165_v51  ;;  %v3170_v38 = vld [vmem:[#allocation19 + $0x70] sm:$0xff]  }
 0xcea   : > { %v1916_v6 = vadd.f32 %v2668_v3, %v1907_v4  ;;  %v1908_v7 = vadd.f32 %v1903_v5, %v1688_v54  ;;  %v2884_v8 = vpop.f32.mrb[27].mxu1  ;;  %2763 = vmatprep.subr.bf16.mxu1 %v3166_v52  ;;  %v3168_v54 = vld [vmem:[#allocation19 + $0x68] sm:$0xff]   ;;  %v3171_v5 = vld [vmem:[#allocation19 + $0x30] sm:$0xff]  }
 0xceb   : > { %v3169_v4 = vld [vmem:[#allocation19 + $0x28] sm:$0xff]   ;;  %v1978_v8 = vld [vmem:[#allocation17] sm:$0x3] }
 0xcec   : > { %v1917_v9 = vadd.f32 %v2668_v3, %v1908_v7  ;;  %v1918_v0 = vadd.f32 %v1916_v6, %v4417_v15  ;;  %v3172_v6 = vld [vmem:[#allocation19 + $0x78] sm:$0xff]  }
 0xced   : > { %2764 = vmatpush3.bf16.msra.mxu1 %v3167_v53  ;;  %v3173_v7 = vld [vmem:[#allocation19 + $0x38] sm:$0xff]  }
 0xcee   : > { %1920 = vadd.xlane.f32.xlu0 %v1918_v0  ;;  %v1919_v23 = vadd.f32 %v1917_v9, %v4421_v16  ;;  %2765 = vmatprep.subr.bf16.mxu1 %v3168_v54  ;;  %v1983_v9 = vrot.slane %v1978_v8, %v794_v28 }
 0xcf1   : > { %2766 = vmatpush3.bf16.msra.mxu1 %v3169_v4 }
 0xcf2   : > { %1922 = vadd.xlane.f32.xlu0 %v1919_v23  ;;  %2767 = vmatprep.subr.bf16.mxu1 %v3170_v38 }
 0xcf5   : > { %2768 = vmatpush3.bf16.msra.mxu1 %v3171_v5 }
 0xcf6   : > { %2769 = vmatprep.subr.bf16.mxu1 %v3172_v6 }
 0xcf9   : > { %2770 = vmatpush3.bf16.msra.mxu1 %v3173_v7 }
 0xd7b   : > { %v1921_v14 = vpop.xlane.xlu0 %1920 }
 0xd7c   : > { %v1925_v17 = vmul.f32 0.0078125, %v1921_v14 }
 0xd7e   : > { %v4562_v18 = vsub.f32 %v1918_v0, %v1925_v17  ;;  %v1987_v0 = vrot.slane %v1978_v8, %v798_v26 }
 0xd7f   : > { %v1923_v19 = vpop.xlane.xlu0 %1922 }
 0xd80   : > { %v1926_v20 = vmul.f32 0.0078125, %v1923_v19  ;;  %v1929_v15 = vmul.f32 %v4562_v18, %v4562_v18 }
 0xd82   : > { %v1928_v21 = vsub.f32 %v1919_v23, %v1926_v20  ;;  %1931 = vadd.xlane.f32.xlu0 %v1929_v15 }
 0xd84   : > { %v1930_v16 = vmul.f32 %v1928_v21, %v1928_v21 }
 0xd86   : > { %1933 = vadd.xlane.f32.xlu0 %v1930_v16 }
 0xe0f   : > { %v1932_v55 = vpop.xlane.xlu0 %1931 }
 0xe10   : > { %v1935_v56 = vmul.f32 0.0078125, %v1932_v55 }
 0xe12   : > { %v1937_v57 = vadd.f32 1e-05, %v1935_v56  ;;  %v2704_v56 = vld [vmem:[#allocation25] ss:$0 sm:$0xff] }
 0xe13   : > { %v1934_v58 = vpop.xlane.xlu0 %1933 }
 0xe14   : > { %3206 = vrsqrt.f32 %v1937_v57  ;;  %v1936_v59 = vmul.f32 0.0078125, %v1934_v58  ;;  %v2705_v58 = vld [vmem:[#allocation26] ss:$0 sm:$0xff] }
 0xe16   : > { %v1938_v60 = vadd.f32 1e-05, %v1936_v59 }
 0xe18   : > { %3208 = vrsqrt.f32 %v1938_v60 }
 0xe1e   : > { %v3207_v61 = vpop.eup %3206 }
 0xe1f   : > { %v1941_v62 = vmul.f32 %v3207_v61, %v4562_v18 }
 0xe21   : > { %v1950_v39 = vmul.f32 %v2669_v33, %v1941_v62 }
 0xe22   : > { %v3209_v41 = vpop.eup %3208 }
 0xe23   : > { %v1942_v44 = vmul.f32 %v3209_v41, %v1928_v21  ;;  %v1959_v40 = vadd.f32 %v2670_v63, %v1950_v39 }
 0xe25   : > { %v1951_v1 = vmul.f32 %v2669_v33, %v1942_v44 }
 0xe27   : > { %v1960_v2 = vadd.f32 %v2670_v63, %v1951_v1 }
 0xe29   : > { %v1961_v3 = vpack.c.bf16 %v1960_v2, %v1959_v40 }
 0xe2b   : > { %2103 = vmatmul.mubr.bf16.vlgmr.msra.gmra.mrb[28].mxu0 %v1961_v3 }
 0xefe   : > { %v2104_v23 = vpop.f32.mrb[28].mxu0 }
 0xeff   : > { %v2105_v10 = vadd.f32 %v2104_v23, %v1983_v9  ;;  %v2106_v11 = vpop.f32.mrb[29].mxu0 }
 0xf00   : > { %v2107_v12 = vadd.f32 %v2106_v11, %v1987_v0  ;;  %v2108_v13 = vpop.f32.mrb[30].mxu0 }
 0xf01   : > { %v2109_v14 = vadd.f32 %v2108_v13, %v1983_v9  ;;  %v2110_v17 = vpop.f32.mrb[31].mxu0  ;;  %v2113_v19 = vmax.f32 %v2105_v10, 0.0 }
 0xf02   : > { %v2111_v18 = vadd.f32 %v2110_v17, %v1987_v0  ;;  %v2114_v15 = vmax.f32 %v2107_v12, 0.0 }
 0xf03   : > { %v2115_v20 = vmax.f32 %v2109_v14, 0.0 }
 0xf04   : > { %v2116_v21 = vmax.f32 %v2111_v18, 0.0 }
 0xf05   : > { %v2117_v16 = vpack.c.bf16 %v2115_v20, %v2113_v19 }
 0xf06   : > { %v2118_v22 = vpack.c.bf16 %v2116_v21, %v2114_v15 }
 0xf08   : > { %2286 = vmatprep.mubr.bf16.mxu1 %v2118_v22 }
 0xf09   : > { %2287 = vmatmul.mubr.bf16.vlgmr.msra.gmra.mrb[28].mxu1 %v2117_v16 }
 0xfdc   : > { %v2771_v28 = vpop.f32.mrb[28].mxu1 }
 0xfdd   : > { %v2772_v25 = vpop.f32.mrb[29].mxu1 }
 0xfde   : > { %v2773_v26 = vadd.f32 %v2772_v25, %v2771_v28  ;;  %v2774_v27 = vpop.f32.mrb[30].mxu1 }
 0xfdf   : > { %v2775_v29 = vpop.f32.mrb[31].mxu1 }
 0xfe0   : > { %v2289_v30 = vadd.f32 %v2773_v26, %v2687_v24  ;;  %v2776_v31 = vadd.f32 %v2775_v29, %v2774_v27 }
 0xfe2   : > { %v2292_v32 = vadd.f32 %v2776_v31, %v2687_v24  ;;  %v2295_v34 = vadd.f32 %v2289_v30, %v1959_v40 }
 0xfe4   : > { %2297 = vadd.xlane.f32.xlu0 %v2295_v34  ;;  %v2296_v35 = vadd.f32 %v2292_v32, %v1960_v2 }
 0xfe8   : > { %2299 = vadd.xlane.f32.xlu0 %v2296_v35 }
0x1071   : > { %v2298_v36 = vpop.xlane.xlu0 %2297 }
0x1072   : > { %v2301_v37 = vmul.f32 0.0078125, %v2298_v36 }
0x1074   : > { %v2303_v42 = vsub.f32 %v2295_v34, %v2301_v37 }
0x1075   : > { %v2300_v43 = vpop.xlane.xlu0 %2299 }
0x1076   : > { %v2302_v45 = vmul.f32 0.0078125, %v2300_v43  ;;  %v2305_v46 = vmul.f32 %v2303_v42, %v2303_v42 }
0x1078   : > { %v2304_v47 = vsub.f32 %v2296_v35, %v2302_v45  ;;  %2307 = vadd.xlane.f32.xlu0 %v2305_v46 }
0x107a   : > { %v2306_v48 = vmul.f32 %v2304_v47, %v2304_v47 }
0x107c   : > { %2309 = vadd.xlane.f32.xlu0 %v2306_v48 }
0x1105   : > { %v2308_v49 = vpop.xlane.xlu0 %2307 }
0x1106   : > { %v2311_v50 = vmul.f32 0.0078125, %v2308_v49 }
0x1108   : > { %v2313_v51 = vadd.f32 1e-05, %v2311_v50 }
0x1109   : > { %v2310_v52 = vpop.xlane.xlu0 %2309 }
0x110a   : > { %3210 = vrsqrt.f32 %v2313_v51  ;;  %v2312_v53 = vmul.f32 0.0078125, %v2310_v52 }
0x110c   : > { %v2314_v54 = vadd.f32 1e-05, %v2312_v53 }
0x110e   : > { %3212 = vrsqrt.f32 %v2314_v54 }
0x1114   : > { %v3211_v55 = vpop.eup %3210 }
0x1115   : > { %v2317_v57 = vmul.f32 %v3211_v55, %v2303_v42 }
0x1117   : > { %v2326_v59 = vmul.f32 %v2704_v56, %v2317_v57 }
0x1118   : > { %v3213_v60 = vpop.eup %3212 }
0x1119   : > { %v2335_v61 = vadd.f32 %v2705_v58, %v2326_v59  ;;  %v2318_v62 = vmul.f32 %v3213_v60, %v2304_v47 }
0x111b   : > { %v2327_v33 = vmul.f32 %v2704_v56, %v2318_v62  ;;  %2337 = vst [vmem:[%s764_s3] sm:$0xff] %v2335_v61 }
0x111d   : > { %v2336_v41 = vadd.f32 %v2705_v58, %v2327_v33 }
0x111f   : > { %2338 = vst [vmem:[%s764_s3 + $0x8] sm:$0xff] %v2336_v41 }
0x1120   : > { %3679 = shalt.err (!%p3676_p10)
}
0x1121   : > { %s3680_s1 = scalar_lea.hbm %s4576_s4, 256  ;;  %s3684_s25 = scalar_lea.hbm %s4719_s16, 512 }
0x1122   : > { %p3681_p5 = scmp.ne.s32.totalorder %s4576_s4, %s3680_s1  ;;  %p3685_p8 = scmp.lt.u32.totalorder %s4576_s4, %s4719_s16 }
0x1123   : > { %p3686_p11 = scmp.lt.u32.totalorder %s3684_s25, %s3680_s1  ;;  %p3688_p12 = scmp.lt.u32.totalorder %s3680_s1, %s4576_s4 }
0x1124   : > { %p3682_p7 = pnand %p3681_p5, %p4720_p13 }
0x1125   : > { %p3687_p0 = por %p3686_p11, %p3685_p8 }
0x1126   : > { %p3683_p9 = pneg %p3682_p7 }
0x1127   : > { %p3689_p1 = por %p3688_p12, %p3687_p0 }
0x1129   : > { %p3690_p3 = pnand %p3689_p1, %p3683_p9 }
0x112b   : > { %3693 = shalt.err (!%p3690_p3)
}
0x112c   : > { %s3797_s3 = smov 128   ;;  %s3798_s23 = smov 8  }
0x112d   : > { %2945 = dma.vmem_to_hbm [thread:$0]  (%p4720_p13), %s4578_s8, 256, %s4576_s4, %s2340_s0, %s3797_s3, %s3797_s3, %s3798_s23  }
0x112e PF: > { %s4721_s26 = sld [smem:[#allocation40_spill]]  ;;  %p4722_p6 = scmp.ne.s32.totalorder %s4696_s22, 0 }
0x112f   : > { %p4723_p2 = scmp.ge.s32.totalorder %s3768_s24, 2 }
0x1131   : > { %p2998_p4 = pnand %p4723_p2, %p4722_p6 }
0x1134   : > { %s2368_s20 = sand.u32 1, %s4721_s26  }
0x1135   : > { %s2369_s29 = scalar_lea.sflag [#allocation4], %s2368_s20 }
0x1136   : > { %3751 = dma.done.wait (!%p2998_p4), %s2369_s29, 256  }
0x1137   : > { %3753 = vsyncadd (!%p2998_p4), %s2369_s29, 4294967040  ;;  %s4724_s7 = sld [smem:[#allocation41_spill]]  ;;  %s4725_s22 = sld [smem:[#allocation42_spill]] }
0x1138   : > { %s4726_s28 = smov %s4243_s21  ;;  %p39_p10 = scmp.ge.s32.totalorder %s4243_s21, 4  }
0x1139   : > { %s4728_s23 = smov %s4254_s19  ;;  %s4729_s24 = smov %s4726_s28 }
0x113a   :  { %41 = sbr.rel (!%p39_p10) target bundleno = 26 (0x1a), region = 201 }
0x113d   : > { %s4727_s21 = smov %s4724_s7 }
0x1141   :  { %2374 = vsyncpa [#allocation3], 1 }
0x1142   :  { %2376 = vsyncpa [#allocation3 + $0x1], 1 }
0x1143   :  { %2377 = vsyncpa [#allocation6], 1 }
0x1144   :  { %2379 = vsyncpa [#allocation6 + $0x1], 1 }
0x1145   :  { %2380 = vsyncpa [#allocation9], 1 }
0x1146   :  { %2381 = vsyncpa [#allocation12], 1 }
0x1147   :  { %2382 = vsyncpa [#allocation15], 1 }
0x1148   :  { %2383 = vsyncpa [#allocation18], 1 }
0x1149   :  { %2384 = vsyncpa [#allocation21], 1 }
0x114a   :  { %2385 = vsyncpa [#allocation24], 1 }
0x114b   :  { %2386 = vsyncpa [#allocation27], 1 }
0x114c   :  { %2387 = vsyncpa [#allocation4], 1 }
0x114d   :  { %2389 = vsyncpa [#allocation4 + $0x1], 1 }

</bundles_post_ra>
